<compile_context>
chip_gen: v7x
topology: tpu7x:2x2x1
jax: 0.10.0
libtpu: 0.0.40
codegen_flags: <defaults>
</compile_context>

<pallas_src>
import functools

import jax
import jax.numpy as jnp
from jax import lax
from jax.experimental import pallas as pl
from jax.experimental.pallas import tpu as pltpu

_LANE = 128     # lane width / channel padding granularity
_SUBLANE = 8    # sublane width / W padding granularity


def _round_up(x, m):
    return (x + m - 1) // m * m


def _transition_up_kernel(x_ref, halo_ref, w00_ref, w01_ref, w10_ref, w11_ref,
                          b_ref, o_ref):
    """One (block_rows, W) tile of the stride-2 transposed conv.

    x_ref:    (th, W, Ci)      current rows of the image (channel padded).
    halo_ref: (1,  W, Ci)      the row just below this tile (zeros past edge).
    w00_ref:  (Ci, 4*Co)       packed taps [w11|w12|w21|w22] for x[r, q].
    w01_ref:  (Ci, 2*Co)       packed taps [w10|w20]         for x[r, q+1].
    w10_ref:  (Ci, 2*Co)       packed taps [w01|w02]         for x[r+1, q].
    w11_ref:  (Ci, Co)         tap w00                       for x[r+1, q+1].
    b_ref:    (1, Co)          bias (f32).
    o_ref:    (th, 2, W, 2*Co)
        o[r, p, q, 0:Co]   = output(2r+p, 2q)
        o[r, p, q, Co:2Co] = output(2r+p, 2q+1)
    """
    th, W, Ci = x_ref.shape
    Co = w11_ref.shape[1]
    M = th * W

    x00_3 = x_ref[...]                       # (th, W, Ci)  x[r, q]
    halo = halo_ref[...]                     # (1,  W, Ci)  x[r+th, q]

    # Rows shifted down by one image row: x10[r] = x[r+1] (halo past last row).
    if th > 1:
        x10_3 = jnp.concatenate([x00_3[1:], halo], axis=0)
    else:
        x10_3 = halo

    # Columns shifted left by one: x01[r, q] = x[r, q+1], zero at q = W-1.
    if jnp.dtype(x00_3.dtype).itemsize >= 4:
        # XLU sublane rotate + one mask (no full-tile concatenate copies).
        keep = lax.broadcasted_iota(jnp.int32, (th, W, Ci), 1) < (W - 1)

        def shift_cols(a):
            return jnp.where(keep, pltpu.roll(a, W - 1, axis=1), 0).astype(a.dtype)
    else:
        # Packed (sub-32-bit) dtypes: fall back to the concat formulation.
        zcol = jnp.zeros((th, 1, Ci), x00_3.dtype)

        def shift_cols(a):
            return jnp.concatenate([a[:, 1:, :], zcol], axis=1)

    x01_3 = shift_cols(x00_3)
    x11_3 = shift_cols(x10_3)

    x00 = x00_3.reshape(M, Ci)
    x01 = x01_3.reshape(M, Ci)
    x10 = x10_3.reshape(M, Ci)
    x11 = x11_3.reshape(M, Ci)

    # Four packed MXU matmuls, f32 accumulation.
    y00 = jnp.dot(x00, w00_ref[...], preferred_element_type=jnp.float32)  # (M, 4Co)
    y01 = jnp.dot(x01, w01_ref[...], preferred_element_type=jnp.float32)  # (M, 2Co)
    y10 = jnp.dot(x10, w10_ref[...], preferred_element_type=jnp.float32)  # (M, 2Co)
    y11 = jnp.dot(x11, w11_ref[...], preferred_element_type=jnp.float32)  # (M, Co)

    b = b_ref[...]                                                        # (1, Co)

    ee = y00[:, 0 * Co:1 * Co] + b
    eo = y00[:, 1 * Co:2 * Co] + y01[:, 0:Co] + b
    oe = y00[:, 2 * Co:3 * Co] + y10[:, 0:Co] + b
    oo = (y00[:, 3 * Co:4 * Co] + y01[:, Co:2 * Co]
          + y10[:, Co:2 * Co] + y11 + b)

    odt = o_ref.dtype
    o_ref[:, 0, :, 0:Co] = ee.reshape(th, W, Co).astype(odt)
    o_ref[:, 0, :, Co:2 * Co] = eo.reshape(th, W, Co).astype(odt)
    o_ref[:, 1, :, 0:Co] = oe.reshape(th, W, Co).astype(odt)
    o_ref[:, 1, :, Co:2 * Co] = oo.reshape(th, W, Co).astype(odt)


def _vmem_capacity_bytes():
    try:
        cap = getattr(pltpu.get_tpu_info(), "vmem_capacity_bytes", None)
        if cap:
            return int(cap)
    except Exception:
        pass
    return 64 << 20          # conservative fallback (v7x per-TensorCore VMEM)


def _choose_block_rows(H, Wp, Ci, Co, in_it, out_it, budget):
    """Largest row-block whose pipelined VMEM footprint fits `budget`.

    Per row of the tile:
      inputs   : 2x tile (double buffered) + 3 shifted copies -> 5*Wp*Ci*in_it
      col mask : iota/compare temp                            -> Wp*Ci*4
      outputs  : 2 row-phases x 2*Co lanes, double buffered   -> 8*Wp*Co*out_it
      f32 acc  : y00..y11 (9*Co lanes) + 4 phase temps        -> 13*Wp*Co*4
    Fixed: halo, packed weights (double buffered), bias, slack.
    """
    per_row = Wp * (Ci * (5 * in_it + 4) + Co * (8 * out_it + 52))
    fixed = 2 * (Wp * Ci * in_it + 9 * Ci * Co * in_it + 4 * Co) + (1 << 20)
    avail = budget - fixed
    th = avail // per_row if avail > per_row else 1
    th = min(th, H, max(1, 32768 // Wp))     # also bound the DMA chunk size
    return int(max(1, th))


@functools.partial(jax.jit,
                   static_argnames=("block_rows", "matmul_dtype", "out_dtype"))
def transition_up_nhwc(x_nhwc, weight, bias, *, block_rows=None,
                       matmul_dtype=None, out_dtype=None):
    """ConvTranspose2d(C, C, k=3, s=2, p=1, output_padding=1), NHWC in/out.

    x_nhwc: (N, H, W, C_in);  weight: (C_in, C_out, 3, 3)  (PyTorch layout);
    bias: (C_out,).  Returns (N, 2H, 2W, C_out).
    matmul_dtype: dtype fed to the MXU (bfloat16 recommended on v6e/v7x for
    large C; f32 accumulation is always used).  out_dtype: result dtype.
    """
    N, H, W, Cin = x_nhwc.shape
    Cout = weight.shape[1]
    odt = jnp.dtype(out_dtype) if out_dtype is not None else x_nhwc.dtype
    mdt = jnp.dtype(matmul_dtype) if matmul_dtype is not None else x_nhwc.dtype
    in_it = jnp.dtype(mdt).itemsize
    out_it = jnp.dtype(odt).itemsize

    # Pad channels to the 128-lane granularity and W to a sublane multiple so
    # every matmul / lane slice / reshape / store in the kernel is tile-aligned.
    Ci = _round_up(Cin, _LANE)
    Co = _round_up(Cout, _LANE)
    Wp = _round_up(W, _SUBLANE)

    cap = _vmem_capacity_bytes()
    vmem_limit = max(32 << 20, min(cap - (8 << 20), int(cap * 0.9)))
    if block_rows is None:
        th = _choose_block_rows(H, Wp, Ci, Co, in_it, out_it,
                                vmem_limit - (2 << 20))
    else:
        th = max(1, min(int(block_rows), H))

    n_blk = pl.cdiv(H, th)
    H_pad = n_blk * th

    x = x_nhwc.astype(mdt)
    if (H_pad, Wp, Ci) != (H, W, Cin):
        x = jnp.pad(x, ((0, 0), (0, H_pad - H), (0, Wp - W), (0, Ci - Cin)))

    # One-row halo per row-block: image row (i+1)*th (zeros past the bottom).
    halo = jnp.concatenate(
        [x[:, th::th, :, :], jnp.zeros((N, 1, Wp, Ci), mdt)], axis=1)

    # (Cin, Cout, 3, 3) -> zero-pad channels -> pack taps along Cout (lanes).
    w = jnp.pad(weight, ((0, Ci - Cin), (0, Co - Cout), (0, 0), (0, 0))).astype(mdt)
    tap = lambda kh, kw: w[:, :, kh, kw]                      # (Ci, Co)
    w00 = jnp.concatenate([tap(1, 1), tap(1, 2), tap(2, 1), tap(2, 2)], axis=1)
    w01 = jnp.concatenate([tap(1, 0), tap(2, 0)], axis=1)
    w10 = jnp.concatenate([tap(0, 1), tap(0, 2)], axis=1)
    w11 = tap(0, 0)
    b2 = jnp.pad(bias, (0, Co - Cout)).reshape(1, Co).astype(jnp.float32)

    out = pl.pallas_call(
        _transition_up_kernel,
        out_shape=jax.ShapeDtypeStruct((N, H_pad, 2, Wp, 2 * Co), odt),
        grid_spec=pltpu.PrefetchScalarGridSpec(
            num_scalar_prefetch=0,
            grid=(N, n_blk),
            in_specs=[
                pl.BlockSpec((None, th, Wp, Ci), lambda n, i: (n, i, 0, 0)),
                pl.BlockSpec((None, 1, Wp, Ci), lambda n, i: (n, i, 0, 0)),
                pl.BlockSpec((Ci, 4 * Co), lambda n, i: (0, 0)),
                pl.BlockSpec((Ci, 2 * Co), lambda n, i: (0, 0)),
                pl.BlockSpec((Ci, 2 * Co), lambda n, i: (0, 0)),
                pl.BlockSpec((Ci, Co), lambda n, i: (0, 0)),
                pl.BlockSpec((1, Co), lambda n, i: (0, 0)),
            ],
            out_specs=pl.BlockSpec((None, th, 2, Wp, 2 * Co),
                                   lambda n, i: (n, i, 0, 0, 0)),
        ),
        compiler_params=pltpu.CompilerParams(
            dimension_semantics=("parallel", "parallel"),
            vmem_limit_bytes=int(vmem_limit)),
    )(x, halo, w00, w01, w10, w11, b2)

    # Fused sub-pixel interleave: pure reshape, then crop spatial/channel pads.
    y = out.reshape(N, 2 * H_pad, 2 * Wp, Co)
    return y[:, :2 * H, :2 * W, :Cout]


@functools.partial(jax.jit,
                   static_argnames=("block_rows", "matmul_dtype", "out_dtype"))
def transition_up(x_nchw, weight, bias, *, block_rows=None, matmul_dtype=None,
                  out_dtype=None):
    """NCHW wrapper for PyTorch API parity: (N, C, H, W) -> (N, C, 2H, 2W)."""
    # TODO(synk): run the surrounding model in NHWC and call transition_up_nhwc
    # directly; these two layout copies re-read/write the 4x-sized output in
    # HBM and can dominate at small/medium C.
    x = jnp.transpose(x_nchw, (0, 2, 3, 1))
    y = transition_up_nhwc(x, weight, bias, block_rows=block_rows,
                           matmul_dtype=matmul_dtype, out_dtype=out_dtype)
    return jnp.transpose(y, (0, 3, 1, 2))


def transition_up_reference(x_nchw, weight, bias):
    """Pure-JAX scatter reference of ConvTranspose2d(k=3, s=2, p=1, op=1)."""
    N, Cin, H, W = x_nchw.shape
    Cout = weight.shape[1]
    full = jnp.zeros((N, Cout, 2 * H + 1, 2 * W + 1), jnp.float32)
    for kh in range(3):
        for kw in range(3):
            t = jnp.einsum('nihw,io->nohw', x_nchw.astype(jnp.float32),
                           weight[:, :, kh, kw].astype(jnp.float32))
            full = full.at[:, :, kh:kh + 2 * H:2, kw:kw + 2 * W:2].add(t)
    y = full[:, :, 1:1 + 2 * H, 1:1 + 2 * W]
    return y + bias.reshape(1, Cout, 1, 1).astype(jnp.float32)


if __name__ == "__main__":
    key = jax.random.PRNGKey(0)
    kx, kw, kb, kx2 = jax.random.split(key, 4)

    N, C, H, W = 2, 4, 16, 16
    fan = C * 3 * 3
    bound = 1.0 / (fan ** 0.5)
    x = jax.random.normal(kx, (N, C, H, W), jnp.float32)
    weight = jax.random.uniform(kw, (C, C, 3, 3), jnp.float32, -bound, bound)
    bias = jax.random.uniform(kb, (C,), jnp.float32, -bound, bound)

    y_ref = transition_up_reference(x, weight, bias)

    # 1) Default tiling (auto block_rows; single row-block at this size).
    y = jax.block_until_ready(transition_up(x, weight, bias))
    assert y.shape == (N, C, 2 * H, 2 * W), y.shape
    err = float(jnp.max(jnp.abs(y - y_ref)))
    assert err < 1e-4, f"f32 default tiling mismatch: {err}"

    # 2) Multi-row-block path (real halo rows across block boundaries).
    y2 = jax.block_until_ready(transition_up(x, weight, bias, block_rows=4))
    err2 = float(jnp.max(jnp.abs(y2 - y_ref)))
    assert err2 < 1e-4, f"f32 block_rows=4 mismatch: {err2}"

    # 3) Row-padding path (H not a multiple of block_rows).
    y3 = jax.block_until_ready(transition_up(x, weight, bias, block_rows=5))
    err3 = float(jnp.max(jnp.abs(y3 - y_ref)))
    assert err3 < 1e-4, f"f32 block_rows=5 mismatch: {err3}"

    # 4) Odd spatial size (W padded to a sublane multiple, H padded to blocks).
    xo = jax.random.normal(kx2, (1, 3, 5, 6), jnp.float32)
    wo = jax.random.uniform(kw, (3, 3, 3, 3), jnp.float32, -bound, bound)
    bo = jax.random.uniform(kb, (3,), jnp.float32, -bound, bound)
    yo = jax.block_until_ready(transition_up(xo, wo, bo, block_rows=2))
    yo_ref = transition_up_reference(xo, wo, bo)
    assert yo.shape == (1, 3, 10, 12), yo.shape
    erro = float(jnp.max(jnp.abs(yo - yo_ref)))
    assert erro < 1e-4, f"f32 odd-shape mismatch: {erro}"

    # 5) bf16 MXU path (recommended on v6e/v7x); f32 accumulation is kept.
    yb = jax.block_until_ready(
        transition_up(x, weight, bias, block_rows=4, matmul_dtype=jnp.bfloat16))
    errb = float(jnp.max(jnp.abs(yb - y_ref)))
    assert errb < 5e-2, f"bf16 matmul path mismatch: {errb}"

    print("KERNEL_OK")
</pallas_src>

<mosaic_0001>
module attributes {stable_mosaic.version = 11 : i64} {
  func.func @_transition_up_kernel(%arg0: i32, %arg1: i32, %arg2: memref<1x16x16x128xf32, #tpu.memory_space<vmem>>, %arg3: memref<1x1x16x128xf32, #tpu.memory_space<vmem>>, %arg4: memref<128x512xf32, #tpu.memory_space<vmem>>, %arg5: memref<128x256xf32, #tpu.memory_space<vmem>>, %arg6: memref<128x256xf32, #tpu.memory_space<vmem>>, %arg7: memref<128x128xf32, #tpu.memory_space<vmem>>, %arg8: memref<1x128xf32, #tpu.memory_space<vmem>>, %arg9: memref<1x16x2x16x256xf32, #tpu.memory_space<vmem>>) attributes {dimension_semantics = [#tpu.dimension_semantics<parallel>, #tpu.dimension_semantics<parallel>], iteration_bounds = array<i64: 2, 1>, scalar_prefetch = 0 : i64, scratch_operands = 0 : i64, tpu.core_type = #tpu.core_type<tc>, window_params = [{transform_indices = @transform_0, window_bounds = array<i64: 1, 16, 16, 128>}, {transform_indices = @transform_1, window_bounds = array<i64: 1, 1, 16, 128>}, {pipeline_mode = #tpu.pipeline_mode<synchronous>, transform_indices = @transform_2, window_bounds = array<i64: 128, 512>}, {pipeline_mode = #tpu.pipeline_mode<synchronous>, transform_indices = @transform_3, window_bounds = array<i64: 128, 256>}, {pipeline_mode = #tpu.pipeline_mode<synchronous>, transform_indices = @transform_4, window_bounds = array<i64: 128, 256>}, {pipeline_mode = #tpu.pipeline_mode<synchronous>, transform_indices = @transform_5, window_bounds = array<i64: 128, 128>}, {pipeline_mode = #tpu.pipeline_mode<synchronous>, transform_indices = @transform_6, window_bounds = array<i64: 1, 128>}, {transform_indices = @transform_7, window_bounds = array<i64: 1, 16, 2, 16, 256>}]} {
    %c0 = arith.constant 0 : index
    %c0_0 = arith.constant 0 : index
    %c0_1 = arith.constant 0 : index
    %c0_2 = arith.constant 0 : index
    %0 = vector.load %arg2[%c0, %c0_0, %c0_1, %c0_2] : memref<1x16x16x128xf32, #tpu.memory_space<vmem>>, vector<1x16x16x128xf32>
    %1 = vector.shape_cast %0 : vector<1x16x16x128xf32> to vector<16x16x128xf32>
    %c0_3 = arith.constant 0 : index
    %c0_4 = arith.constant 0 : index
    %c0_5 = arith.constant 0 : index
    %c0_6 = arith.constant 0 : index
    %2 = vector.load %arg3[%c0_3, %c0_4, %c0_5, %c0_6] : memref<1x1x16x128xf32, #tpu.memory_space<vmem>>, vector<1x1x16x128xf32>
    %3 = vector.shape_cast %2 : vector<1x1x16x128xf32> to vector<1x16x128xf32>
    %4 = vector.extract_strided_slice %1 {offsets = [1, 0, 0], sizes = [15, 16, 128], strides = [1, 1, 1]} : vector<16x16x128xf32> to vector<15x16x128xf32>
    %5 = tpu.concatenate %4, %3 in 0 : vector<15x16x128xf32>, vector<1x16x128xf32> -> vector<16x16x128xf32>
    %6 = tpu.iota {dimensions = array<i32: 1>} : vector<16x16x128xi32>
    %c15_i32 = arith.constant 15 : i32
    %7 = vector.broadcast %c15_i32 : i32 to vector<16x16x128xi32>
    %8 = arith.cmpi slt, %6, %7 : vector<16x16x128xi32>
    %c15_i32_7 = arith.constant 15 : i32
    %9 = tpu.dynamic_rotate %1 by %c15_i32_7 dim 1 : vector<16x16x128xf32>, i32 -> vector<16x16x128xf32>
    %c0_i32 = arith.constant 0 : i32
    %10 = arith.sitofp %c0_i32 : i32 to f32
    %11 = vector.broadcast %10 : f32 to vector<16x16x128xf32>
    %12 = arith.select %8, %9, %11 : vector<16x16x128xi1>, vector<16x16x128xf32>
    %c15_i32_8 = arith.constant 15 : i32
    %13 = tpu.dynamic_rotate %5 by %c15_i32_8 dim 1 : vector<16x16x128xf32>, i32 -> vector<16x16x128xf32>
    %c0_i32_9 = arith.constant 0 : i32
    %14 = arith.sitofp %c0_i32_9 : i32 to f32
    %15 = vector.broadcast %14 : f32 to vector<16x16x128xf32>
    %16 = arith.select %8, %13, %15 : vector<16x16x128xi1>, vector<16x16x128xf32>
    %17 = vector.shape_cast %1 : vector<16x16x128xf32> to vector<256x128xf32>
    %18 = vector.shape_cast %12 : vector<16x16x128xf32> to vector<256x128xf32>
    %19 = vector.shape_cast %5 : vector<16x16x128xf32> to vector<256x128xf32>
    %20 = vector.shape_cast %16 : vector<16x16x128xf32> to vector<256x128xf32>
    %c0_10 = arith.constant 0 : index
    %c0_11 = arith.constant 0 : index
    %21 = vector.load %arg4[%c0_10, %c0_11] : memref<128x512xf32, #tpu.memory_space<vmem>>, vector<128x512xf32>
    %cst = arith.constant dense<0.000000e+00> : vector<256x512xf32>
    %22 = tpu.matmul %17, %21, %cst {dimension_numbers = #tpu.dot_dimension_numbers<[1], [0], [0], [1], [0, 0, 1, 1], [], []>} : vector<256x128xf32>, vector<128x512xf32>, vector<256x512xf32> -> vector<256x512xf32>
    %c0_12 = arith.constant 0 : index
    %c0_13 = arith.constant 0 : index
    %23 = vector.load %arg5[%c0_12, %c0_13] : memref<128x256xf32, #tpu.memory_space<vmem>>, vector<128x256xf32>
    %cst_14 = arith.constant dense<0.000000e+00> : vector<256x256xf32>
    %24 = tpu.matmul %18, %23, %cst_14 {dimension_numbers = #tpu.dot_dimension_numbers<[1], [0], [0], [1], [0, 0, 1, 1], [], []>} : vector<256x128xf32>, vector<128x256xf32>, vector<256x256xf32> -> vector<256x256xf32>
    %c0_15 = arith.constant 0 : index
    %c0_16 = arith.constant 0 : index
    %25 = vector.load %arg6[%c0_15, %c0_16] : memref<128x256xf32, #tpu.memory_space<vmem>>, vector<128x256xf32>
    %cst_17 = arith.constant dense<0.000000e+00> : vector<256x256xf32>
    %26 = tpu.matmul %19, %25, %cst_17 {dimension_numbers = #tpu.dot_dimension_numbers<[1], [0], [0], [1], [0, 0, 1, 1], [], []>} : vector<256x128xf32>, vector<128x256xf32>, vector<256x256xf32> -> vector<256x256xf32>
    %c0_18 = arith.constant 0 : index
    %c0_19 = arith.constant 0 : index
    %27 = vector.load %arg7[%c0_18, %c0_19] : memref<128x128xf32, #tpu.memory_space<vmem>>, vector<128x128xf32>
    %cst_20 = arith.constant dense<0.000000e+00> : vector<256x128xf32>
    %28 = tpu.matmul %20, %27, %cst_20 {dimension_numbers = #tpu.dot_dimension_numbers<[1], [0], [0], [1], [0, 0, 1, 1], [], []>} : vector<256x128xf32>, vector<128x128xf32>, vector<256x128xf32> -> vector<256x128xf32>
    %c0_21 = arith.constant 0 : index
    %c0_22 = arith.constant 0 : index
    %29 = vector.load %arg8[%c0_21, %c0_22] : memref<1x128xf32, #tpu.memory_space<vmem>>, vector<1x128xf32>
    %30 = vector.extract_strided_slice %22 {offsets = [0, 0], sizes = [256, 128], strides = [1, 1]} : vector<256x512xf32> to vector<256x128xf32>
    %31 = vector.broadcast %29 : vector<1x128xf32> to vector<256x128xf32>
    %32 = arith.addf %30, %31 : vector<256x128xf32>
    %33 = vector.extract_strided_slice %22 {offsets = [0, 128], sizes = [256, 128], strides = [1, 1]} : vector<256x512xf32> to vector<256x128xf32>
    %34 = vector.extract_strided_slice %24 {offsets = [0, 0], sizes = [256, 128], strides = [1, 1]} : vector<256x256xf32> to vector<256x128xf32>
    %35 = arith.addf %33, %34 : vector<256x128xf32>
    %36 = vector.broadcast %29 : vector<1x128xf32> to vector<256x128xf32>
    %37 = arith.addf %35, %36 : vector<256x128xf32>
    %38 = vector.extract_strided_slice %22 {offsets = [0, 256], sizes = [256, 128], strides = [1, 1]} : vector<256x512xf32> to vector<256x128xf32>
    %39 = vector.extract_strided_slice %26 {offsets = [0, 0], sizes = [256, 128], strides = [1, 1]} : vector<256x256xf32> to vector<256x128xf32>
    %40 = arith.addf %38, %39 : vector<256x128xf32>
    %41 = vector.broadcast %29 : vector<1x128xf32> to vector<256x128xf32>
    %42 = arith.addf %40, %41 : vector<256x128xf32>
    %43 = vector.extract_strided_slice %22 {offsets = [0, 384], sizes = [256, 128], strides = [1, 1]} : vector<256x512xf32> to vector<256x128xf32>
    %44 = vector.extract_strided_slice %24 {offsets = [0, 128], sizes = [256, 128], strides = [1, 1]} : vector<256x256xf32> to vector<256x128xf32>
    %45 = arith.addf %43, %44 : vector<256x128xf32>
    %46 = vector.extract_strided_slice %26 {offsets = [0, 128], sizes = [256, 128], strides = [1, 1]} : vector<256x256xf32> to vector<256x128xf32>
    %47 = arith.addf %45, %46 : vector<256x128xf32>
    %48 = arith.addf %47, %28 : vector<256x128xf32>
    %49 = vector.broadcast %29 : vector<1x128xf32> to vector<256x128xf32>
    %50 = arith.addf %48, %49 : vector<256x128xf32>
    %51 = vector.shape_cast %32 : vector<256x128xf32> to vector<16x16x128xf32>
    %c0_23 = arith.constant 0 : index
    %c0_24 = arith.constant 0 : index
    %c0_25 = arith.constant 0 : index
    %c0_26 = arith.constant 0 : index
    %c0_27 = arith.constant 0 : index
    %52 = vector.load %arg9[%c0_23, %c0_24, %c0_25, %c0_26, %c0_27] : memref<1x16x2x16x256xf32, #tpu.memory_space<vmem>>, vector<1x16x1x16x128xf32>
    %53 = vector.shape_cast %52 : vector<1x16x1x16x128xf32> to vector<16x16x128xf32>
    %54 = vector.shape_cast %51 : vector<16x16x128xf32> to vector<1x16x1x16x128xf32>
    tpu.vector_store %arg9[%c0_23, %c0_24, %c0_25, %c0_26, %c0_27], %54 {strides = array<i32>} : memref<1x16x2x16x256xf32, #tpu.memory_space<vmem>>, vector<1x16x1x16x128xf32>,
    %55 = vector.shape_cast %37 : vector<256x128xf32> to vector<16x16x128xf32>
    %c0_28 = arith.constant 0 : index
    %c0_29 = arith.constant 0 : index
    %c0_30 = arith.constant 0 : index
    %c0_31 = arith.constant 0 : index
    %c128 = arith.constant 128 : index
    %56 = vector.load %arg9[%c0_28, %c0_29, %c0_30, %c0_31, %c128] : memref<1x16x2x16x256xf32, #tpu.memory_space<vmem>>, vector<1x16x1x16x128xf32>
    %57 = vector.shape_cast %56 : vector<1x16x1x16x128xf32> to vector<16x16x128xf32>
    %58 = vector.shape_cast %55 : vector<16x16x128xf32> to vector<1x16x1x16x128xf32>
    tpu.vector_store %arg9[%c0_28, %c0_29, %c0_30, %c0_31, %c128], %58 {strides = array<i32>} : memref<1x16x2x16x256xf32, #tpu.memory_space<vmem>>, vector<1x16x1x16x128xf32>,
    %59 = vector.shape_cast %42 : vector<256x128xf32> to vector<16x16x128xf32>
    %c0_32 = arith.constant 0 : index
    %c0_33 = arith.constant 0 : index
    %c1 = arith.constant 1 : index
    %c0_34 = arith.constant 0 : index
    %c0_35 = arith.constant 0 : index
    %60 = vector.load %arg9[%c0_32, %c0_33, %c1, %c0_34, %c0_35] : memref<1x16x2x16x256xf32, #tpu.memory_space<vmem>>, vector<1x16x1x16x128xf32>
    %61 = vector.shape_cast %60 : vector<1x16x1x16x128xf32> to vector<16x16x128xf32>
    %62 = vector.shape_cast %59 : vector<16x16x128xf32> to vector<1x16x1x16x128xf32>
    tpu.vector_store %arg9[%c0_32, %c0_33, %c1, %c0_34, %c0_35], %62 {strides = array<i32>} : memref<1x16x2x16x256xf32, #tpu.memory_space<vmem>>, vector<1x16x1x16x128xf32>,
    %63 = vector.shape_cast %50 : vector<256x128xf32> to vector<16x16x128xf32>
    %c0_36 = arith.constant 0 : index
    %c0_37 = arith.constant 0 : index
    %c1_38 = arith.constant 1 : index
    %c0_39 = arith.constant 0 : index
    %c128_40 = arith.constant 128 : index
    %64 = vector.load %arg9[%c0_36, %c0_37, %c1_38, %c0_39, %c128_40] : memref<1x16x2x16x256xf32, #tpu.memory_space<vmem>>, vector<1x16x1x16x128xf32>
    %65 = vector.shape_cast %64 : vector<1x16x1x16x128xf32> to vector<16x16x128xf32>
    %66 = vector.shape_cast %63 : vector<16x16x128xf32> to vector<1x16x1x16x128xf32>
    tpu.vector_store %arg9[%c0_36, %c0_37, %c1_38, %c0_39, %c128_40], %66 {strides = array<i32>} : memref<1x16x2x16x256xf32, #tpu.memory_space<vmem>>, vector<1x16x1x16x128xf32>,
    return
  }
  func.func @transform_0(%arg0: i32, %arg1: i32) -> (i32, i32, i32, i32) {
    %c0_i32 = arith.constant 0 : i32
    %c0_i32_0 = arith.constant 0 : i32
    %c0_i32_1 = arith.constant 0 : i32
    return %arg0, %arg1, %c0_i32, %c0_i32_0 : i32, i32, i32, i32
  }
  func.func @transform_1(%arg0: i32, %arg1: i32) -> (i32, i32, i32, i32) {
    %c0_i32 = arith.constant 0 : i32
    %c0_i32_0 = arith.constant 0 : i32
    %c0_i32_1 = arith.constant 0 : i32
    return %arg0, %arg1, %c0_i32, %c0_i32_0 : i32, i32, i32, i32
  }
  func.func @transform_2(%arg0: i32, %arg1: i32) -> (i32, i32) {
    %c0_i32 = arith.constant 0 : i32
    %c0_i32_0 = arith.constant 0 : i32
    %c0_i32_1 = arith.constant 0 : i32
    return %c0_i32, %c0_i32_0 : i32, i32
  }
  func.func @transform_3(%arg0: i32, %arg1: i32) -> (i32, i32) {
    %c0_i32 = arith.constant 0 : i32
    %c0_i32_0 = arith.constant 0 : i32
    %c0_i32_1 = arith.constant 0 : i32
    return %c0_i32, %c0_i32_0 : i32, i32
  }
  func.func @transform_4(%arg0: i32, %arg1: i32) -> (i32, i32) {
    %c0_i32 = arith.constant 0 : i32
    %c0_i32_0 = arith.constant 0 : i32
    %c0_i32_1 = arith.constant 0 : i32
    return %c0_i32, %c0_i32_0 : i32, i32
  }
  func.func @transform_5(%arg0: i32, %arg1: i32) -> (i32, i32) {
    %c0_i32 = arith.constant 0 : i32
    %c0_i32_0 = arith.constant 0 : i32
    %c0_i32_1 = arith.constant 0 : i32
    return %c0_i32, %c0_i32_0 : i32, i32
  }
  func.func @transform_6(%arg0: i32, %arg1: i32) -> (i32, i32) {
    %c0_i32 = arith.constant 0 : i32
    %c0_i32_0 = arith.constant 0 : i32
    %c0_i32_1 = arith.constant 0 : i32
    return %c0_i32, %c0_i32_0 : i32, i32
  }
  func.func @transform_7(%arg0: i32, %arg1: i32) -> (i32, i32, i32, i32, i32) {
    %c0_i32 = arith.constant 0 : i32
    %c0_i32_0 = arith.constant 0 : i32
    %c0_i32_1 = arith.constant 0 : i32
    %c0_i32_2 = arith.constant 0 : i32
    return %arg0, %arg1, %c0_i32, %c0_i32_0, %c0_i32_1 : i32, i32, i32, i32, i32
  }
}

</mosaic_0001>

<bundles_post_ra>
// kernel: transition_up_nhwc.1
= control target key start
LH: loop header
LB: loop body
LE: loop exit
PB: predicated region body
PF: predicated region fallthrough
CT: control target
= control target key end

     0   :  { %s2953_s24 = smov 0   ;;  %s2955_s25 = smov 0   ;;  %s4768_s0 = inlined_call_operand.vmem [shape: f32[2,16,16,128], index: 0, kind: input, shape index: {}]   ;;  %s4769_s1 = inlined_call_operand.vmem [shape: f32[2,1,16,128], index: 1, kind: input, shape index: {}]   ;;  %s4770_s2 = inlined_call_operand.vmem [shape: f32[128,512], index: 2, kind: input, shape index: {}]   ;;  %s4771_s3 = inlined_call_operand.vmem [shape: f32[128,256], index: 3, kind: input, shape index: {}]   ;;  %s4772_s4 = inlined_call_operand.vmem [shape: f32[128,256], index: 4, kind: input, shape index: {}]   ;;  %s4773_s5 = inlined_call_operand.vmem [shape: f32[128,128], index: 5, kind: input, shape index: {}]   ;;  %s4774_s6 = inlined_call_operand.vmem [shape: f32[1,128], index: 6, kind: input, shape index: {}]   ;;  %s4775_s7 = inlined_call_operand.vmem [shape: f32[2,16,2,16,256], index: 7, kind: output, shape index: {}]  }
   0x1   :  { %s2957_s26 = smov 0  }
   0x2 LB: > { %s29_s27 = sadd.s32 1, %s2906_s25  ;;  %p2441_p0 = scmp.ge.s32.totalorder %s2910_s26, 1  ;;  %s2910_s26 = sphi %s2957_s26, %s17_s26   ;;  %s2906_s25 = sphi %s2955_s25, %s4835_s25   ;;  %s2902_s24 = sphi %s2953_s24, %s4834_s24  }
   0x3   : > { %p31_p1 = scmp.ge.s32.totalorder %s29_s27, 2  ;;  %p275_p2 = scmp.lt.s32.totalorder %s2910_s26, 3 }
   0x5   : > { %s4837_s27 = smov (%p31_p1, %s29_s27), 0  ;;  %p276_p3 = pnand %p2441_p0, %p275_p2 }
   0x7   : > { %279 = sbr.rel (%p276_p3) target bundleno = 554 (0x22a), region = 48 }
   0xe   : > { %v500_v0 = vld [vmem:[%s4770_s2 + $0x8] sm:$0xff]  ;;  %v499_v2 = vld [vmem:[%s4770_s2] sm:$0xff]  ;;  %p327_p4 = scmp.lt.s32.totalorder %s2902_s24, 1  ;;  %v2912_v7 = vmov 0.0   ;;  %v391_v20 = vlaneseq  ;;  %v502_v56 = vld [vmem:[%s4770_s2 + $0x18] sm:$0xff] }
   0xf   : > { %v504_v1 = vld [vmem:[%s4770_s2 + $0x28] sm:$0xff]  ;;  %v503_v4 = vld [vmem:[%s4770_s2 + $0x20] sm:$0xff]  ;;  %627 = vmatprep.mubr.f32.mxu0 %v2912_v7  ;;  %771 = vmatprep.mubr.f32.mxu1 %v2912_v7  ;;  %v506_v57 = vld [vmem:[%s4770_s2 + $0x38] sm:$0xff] }
  0x10   : > { %v2678_v3 = vpack.c.bf16 %v504_v1, %v500_v0  ;;  %v508_v5 = vld [vmem:[%s4770_s2 + $0x48] sm:$0xff]  ;;  %v2680_v8 = vpack.c.bf16 %v503_v4, %v499_v2  ;;  %v507_v10 = vld [vmem:[%s4770_s2 + $0x40] sm:$0xff]  ;;  %s4839_s24 = smov (!%p327_p4, %s2902_s24), 1  ;;  %v3035_v27 = vshrl.u32 %v391_v20, 7  ;;  %v1080_v59 = vld [vmem:[%s4771_s3 + $0x18] sm:$0xff]  ;;  %v2710_v61 = vpack.c.bf16 %v506_v57, %v502_v56 }
  0x11   : > { %v512_v6 = vld [vmem:[%s4770_s2 + $0x68] sm:$0xff]  ;;  %v511_v11 = vld [vmem:[%s4770_s2 + $0x60] sm:$0xff]  ;;  %s2547_s14 = sshll.u32 %s4839_s24, 8  ;;  %v501_v62 = vld [vmem:[%s4770_s2 + $0x10] sm:$0xff]  ;;  %s2549_s30 = sshll.u32 %s4839_s24, 10 }
  0x12   : > { %v2682_v9 = vpack.c.bf16 %v512_v6, %v508_v5  ;;  %v516_v12 = vld [vmem:[%s4770_s2 + $0x88] sm:$0xff]  ;;  %2679 = vmatprep.subr.bf16.mxu0 %v2678_v3  ;;  %2838 = vmatprep.subr.bf16.mxu1 %v2678_v3  ;;  %v2684_v14 = vpack.c.bf16 %v511_v11, %v507_v10  ;;  %v515_v16 = vld [vmem:[%s4770_s2 + $0x80] sm:$0xff]  ;;  %s3027_s21 = scalar_lea.vmem %s4768_s0, %s2547_s14  ;;  %vm428_vm0 = vcmp.lt.s32.totalorder %v3035_v27, 7  ;;  %v505_v63 = vld [vmem:[%s4770_s2 + $0x30] sm:$0xff]  ;;  %s3921_s12 = scalar_lea.vmem %s4775_s7, %s2549_s30 }
  0x13   : > { %v520_v13 = vld [vmem:[%s4770_s2 + $0xa8] sm:$0xff]  ;;  %2681 = vmatpush1.bf16.msra.mxu0 %v2680_v8  ;;  %2846 = vmatpush1.bf16.msra.mxu1 %v2680_v8  ;;  %v519_v17 = vld [vmem:[%s4770_s2 + $0xa0] sm:$0xff]  ;;  %v1079_v2 = vld [vmem:[%s4771_s3 + $0x10] sm:$0xff]  ;;  %s2548_s13 = sshll.u32 %s4839_s24, 4 }
  0x14   : > { %2683 = vmatprep.subr.bf16.mxu0 %v2682_v9  ;;  %2839 = vmatprep.subr.bf16.mxu1 %v2682_v9  ;;  %v2686_v15 = vpack.c.bf16 %v520_v13, %v516_v12  ;;  %v524_v18 = vld [vmem:[%s4770_s2 + $0xc8] sm:$0xff]  ;;  %v2688_v21 = vpack.c.bf16 %v519_v17, %v515_v16  ;;  %v523_v23 = vld [vmem:[%s4770_s2 + $0xc0] sm:$0xff]  ;;  %v510_v3 = vld [vmem:[%s4770_s2 + $0x58] sm:$0xff]  ;;  %v2712_v9 = vpack.c.bf16 %v505_v63, %v501_v62  ;;  %s345_s24 = scalar_lea.vmem %s4769_s1, %s2548_s13 }
  0x15   : > { %v528_v19 = vld [vmem:[%s4770_s2 + $0xe8] sm:$0xff]  ;;  %v527_v24 = vld [vmem:[%s4770_s2 + $0xe0] sm:$0xff]  ;;  %v514_v4 = vld [vmem:[%s4770_s2 + $0x78] sm:$0xff] }
  0x16   : > { %v2690_v22 = vpack.c.bf16 %v528_v19, %v524_v18  ;;  %v532_v25 = vld [vmem:[%s4770_s2 + $0x108] sm:$0xff]  ;;  %v2692_v28 = vpack.c.bf16 %v527_v24, %v523_v23  ;;  %v3038_v29 = vld [vmem:[%s3027_s21] sm:$0xff]  ;;  %v1084_v6 = vld [vmem:[%s4771_s3 + $0x38] sm:$0xff]  ;;  %v2714_v13 = vpack.c.bf16 %v514_v4, %v510_v3 }
  0x17   : > { %2685 = vmatpush1.bf16.msra.mxu0 %v2684_v14  ;;  %2847 = vmatpush1.bf16.msra.mxu1 %v2684_v14  ;;  %v536_v26 = vld [vmem:[%s4770_s2 + $0x128] sm:$0xff]  ;;  %v531_v31 = vld [vmem:[%s4770_s2 + $0x100] sm:$0xff]  ;;  %v396_v33 = vrot.slane %v3038_v29, 1  ;;  %v509_v11 = vld [vmem:[%s4770_s2 + $0x50] sm:$0xff] }
  0x18   : > { %2687 = vmatprep.subr.bf16.mxu0 %v2686_v15  ;;  %2840 = vmatprep.subr.bf16.mxu1 %v2686_v15  ;;  %v2694_v30 = vpack.c.bf16 %v536_v26, %v532_v25  ;;  %v535_v32 = vld [vmem:[%s4770_s2 + $0x120] sm:$0xff]  ;;  %v540_v34 = vld [vmem:[%s4770_s2 + $0x148] sm:$0xff]  ;;  %v513_v12 = vld [vmem:[%s4770_s2 + $0x70] sm:$0xff] }
  0x19   : > { %v544_v35 = vld [vmem:[%s4770_s2 + $0x168] sm:$0xff]  ;;  %v2696_v38 = vpack.c.bf16 %v535_v32, %v531_v31  ;;  %v539_v40 = vld [vmem:[%s4770_s2 + $0x140] sm:$0xff]  ;;  %v518_v14 = vld [vmem:[%s4770_s2 + $0x98] sm:$0xff]  ;;  %v2716_v20 = vpack.c.bf16 %v513_v12, %v509_v11 }
  0x1a   : > { %v3054_v36 = vld [vmem:[%s3027_s21 + $0x8] sm:$0xff]  ;;  %v2698_v39 = vpack.c.bf16 %v544_v35, %v540_v34  ;;  %v543_v41 = vld [vmem:[%s4770_s2 + $0x160] sm:$0xff]  ;;  %v522_v15 = vld [vmem:[%s4770_s2 + $0xb8] sm:$0xff] }
  0x1b   : > { %2689 = vmatpush1.bf16.msra.mxu0 %v2688_v21  ;;  %2848 = vmatpush1.bf16.msra.mxu1 %v2688_v21  ;;  %v412_v37 = vrot.slane %v3054_v36, 1  ;;  %v548_v44 = vld [vmem:[%s4770_s2 + $0x188] sm:$0xff]  ;;  %v2700_v46 = vpack.c.bf16 %v543_v41, %v539_v40  ;;  %v547_v48 = vld [vmem:[%s4770_s2 + $0x180] sm:$0xff]  ;;  %v1083_v18 = vld [vmem:[%s4771_s3 + $0x30] sm:$0xff]  ;;  %v2718_v21 = vpack.c.bf16 %v522_v15, %v518_v14 }
  0x1c   : > { %2691 = vmatprep.subr.bf16.mxu0 %v2690_v22  ;;  %2841 = vmatprep.subr.bf16.mxu1 %v2690_v22  ;;  %v552_v45 = vld [vmem:[%s4770_s2 + $0x1a8] sm:$0xff]  ;;  %v551_v49 = vld [vmem:[%s4770_s2 + $0x1a0] sm:$0xff]  ;;  %v517_v22 = vld [vmem:[%s4770_s2 + $0x90] sm:$0xff] }
  0x1d   : > { %v3066_v42 = vsel %vm428_vm0, %v396_v33, %v412_v37  ;;  %v3070_v43 = vsel %vm428_vm0, %v412_v37, %v396_v33  ;;  %v2702_v47 = vpack.c.bf16 %v552_v45, %v548_v44  ;;  %v556_v50 = vld [vmem:[%s4770_s2 + $0x1c8] sm:$0xff]  ;;  %v2704_v52 = vpack.c.bf16 %v551_v49, %v547_v48  ;;  %v555_v54 = vld [vmem:[%s4770_s2 + $0x1c0] sm:$0xff]  ;;  %v521_v23 = vld [vmem:[%s4770_s2 + $0xb0] sm:$0xff] }
  0x1e   : > { %v560_v51 = vld [vmem:[%s4770_s2 + $0x1e8] sm:$0xff]  ;;  %v559_v55 = vld [vmem:[%s4770_s2 + $0x1e0] sm:$0xff]  ;;  %v526_v24 = vld [vmem:[%s4770_s2 + $0xd8] sm:$0xff]  ;;  %v2720_v33 = vpack.c.bf16 %v521_v23, %v517_v22 }
  0x1f   : > { %2693 = vmatpush1.bf16.msra.mxu0 %v2692_v28  ;;  %2849 = vmatpush1.bf16.msra.mxu1 %v2692_v28  ;;  %v2706_v53 = vpack.c.bf16 %v560_v51, %v556_v50  ;;  %v1078_v58 = vld [vmem:[%s4771_s3 + $0x8] sm:$0xff]  ;;  %v2708_v60 = vpack.c.bf16 %v559_v55, %v555_v54  ;;  %v1077_v1 = vld [vmem:[%s4771_s3] sm:$0xff]  ;;  %v530_v25 = vld [vmem:[%s4770_s2 + $0xf8] sm:$0xff] }
  0x20   : > { %2695 = vmatprep.subr.bf16.mxu0 %v2694_v30  ;;  %2842 = vmatprep.subr.bf16.mxu1 %v2694_v30  ;;  %v2742_v0 = vpack.c.bf16 %v1080_v59, %v1078_v58  ;;  %v1082_v5 = vld [vmem:[%s4771_s3 + $0x28] sm:$0xff]  ;;  %v3133_v8 = vld [vmem:[%s3027_s21 + $0xc0] sm:$0xff]  ;;  %v2744_v10 = vpack.c.bf16 %v1079_v2, %v1077_v1  ;;  %v1088_v30 = vld [vmem:[%s4771_s3 + $0x58] sm:$0xff]  ;;  %v2722_v34 = vpack.c.bf16 %v530_v25, %v526_v24 }
  0x21   : > { %v2746_v16 = vpack.c.bf16 %v1084_v6, %v1082_v5  ;;  %v1081_v17 = vld [vmem:[%s4771_s3 + $0x20] sm:$0xff]  ;;  %v3157_v19 = vld [vmem:[%s3027_s21 + $0xc8] sm:$0xff]  ;;  %v3182_v31 = vld [vmem:[%s3027_s21 + $0x10] sm:$0xff] }
  0x22   : > { %v2748_v26 = vpack.c.bf16 %v1083_v18, %v1081_v17  ;;  %v1086_v28 = vld [vmem:[%s4771_s3 + $0x48] sm:$0xff]  ;;  %v3185_v32 = vld [vmem:[%s3027_s21 + $0xd0] sm:$0xff]  ;;  %v1085_v41 = vld [vmem:[%s4771_s3 + $0x40] sm:$0xff] }
  0x23   : > { %2697 = vmatpush1.bf16.msra.mxu0 %v2696_v38  ;;  %2850 = vmatpush1.bf16.msra.mxu1 %v2696_v38  ;;  %v525_v35 = vld [vmem:[%s4770_s2 + $0xd0] sm:$0xff]  ;;  %v534_v38 = vld [vmem:[%s4770_s2 + $0x118] sm:$0xff]  ;;  %v2750_v40 = vpack.c.bf16 %v1088_v30, %v1086_v28  ;;  %v1090_v54 = vld [vmem:[%s4771_s3 + $0x68] sm:$0xff] }
  0x24   : > { %2699 = vmatprep.subr.bf16.mxu0 %v2698_v39  ;;  %2843 = vmatprep.subr.bf16.mxu1 %v2698_v39  ;;  %v529_v37 = vld [vmem:[%s4770_s2 + $0xf0] sm:$0xff]  ;;  %v538_v39 = vld [vmem:[%s4770_s2 + $0x138] sm:$0xff]  ;;  %v3238_v56 = vld [vmem:[%s3027_s21 + $0x20] sm:$0xff] }
  0x25   : > { %v1087_v44 = vld [vmem:[%s4771_s3 + $0x50] sm:$0xff]  ;;  %v3210_v45 = vld [vmem:[%s3027_s21 + $0x18] sm:$0xff]  ;;  %v2726_v48 = vpack.c.bf16 %v538_v39, %v534_v38  ;;  %v3241_v57 = vld [vmem:[%s3027_s21 + $0xe0] sm:$0xff] }
  0x26   : > { %v533_v49 = vld [vmem:[%s4770_s2 + $0x110] sm:$0xff]  ;;  %v542_v51 = vld [vmem:[%s4770_s2 + $0x158] sm:$0xff]  ;;  %v1089_v1 = vld [vmem:[%s4771_s3 + $0x60] sm:$0xff] }
  0x27   : > { %2701 = vmatpush1.bf16.msra.mxu0 %v2700_v46  ;;  %2851 = vmatpush1.bf16.msra.mxu1 %v2700_v46  ;;  %v3213_v46 = vld [vmem:[%s3027_s21 + $0xd8] sm:$0xff]  ;;  %v537_v50 = vld [vmem:[%s4770_s2 + $0x130] sm:$0xff]  ;;  %v3266_v3 = vld [vmem:[%s3027_s21 + $0x28] sm:$0xff] }
  0x28   : > { %2703 = vmatprep.subr.bf16.mxu0 %v2702_v47  ;;  %2844 = vmatprep.subr.bf16.mxu1 %v2702_v47  ;;  %v2724_v47 = vpack.c.bf16 %v529_v37, %v525_v35  ;;  %v1092_v55 = vld [vmem:[%s4771_s3 + $0x78] sm:$0xff]  ;;  %v2728_v58 = vpack.c.bf16 %v537_v50, %v533_v49  ;;  %v1091_v2 = vld [vmem:[%s4771_s3 + $0x70] sm:$0xff]  ;;  %v3269_v4 = vld [vmem:[%s3027_s21 + $0xe8] sm:$0xff] }
  0x29   : > { %v550_v62 = vld [vmem:[%s4770_s2 + $0x198] sm:$0xff]  ;;  %v1094_v14 = vld [vmem:[%s4771_s3 + $0x88] sm:$0xff]  ;;  %v3297_v17 = vld [vmem:[%s3027_s21 + $0xf0] sm:$0xff] }
  0x2a   : > { %v554_v63 = vld [vmem:[%s4770_s2 + $0x1b8] sm:$0xff]  ;;  %v561_v22 = vld [vmem:[%s4770_s2 + $0x1f0] sm:$0xff]  ;;  %v1367_v23 = vld [vmem:[%s4772_s4 + $0x8] sm:$0xff] }
  0x2b   : > { %2705 = vmatpush1.bf16.msra.mxu0 %v2704_v52  ;;  %2852 = vmatpush1.bf16.msra.mxu1 %v2704_v52  ;;  %v546_v52 = vld [vmem:[%s4770_s2 + $0x178] sm:$0xff]  ;;  %v2734_v6 = vpack.c.bf16 %v554_v63, %v550_v62  ;;  %v1095_v28 = vld [vmem:[%s4771_s3 + $0x90] sm:$0xff]  ;;  %v1366_v37 = vld [vmem:[%s4772_s4] sm:$0xff] }
  0x2c   : > { %2707 = vmatprep.subr.bf16.mxu0 %v2706_v53  ;;  %2845 = vmatprep.subr.bf16.mxu1 %v2706_v53  ;;  %v2752_v53 = vpack.c.bf16 %v1087_v44, %v1085_v41  ;;  %v2730_v59 = vpack.c.bf16 %v546_v52, %v542_v51  ;;  %v558_v11 = vld [vmem:[%s4770_s2 + $0x1d8] sm:$0xff]  ;;  %v1368_v38 = vld [vmem:[%s4772_s4 + $0x10] sm:$0xff]  ;;  %v1371_v39 = vld [vmem:[%s4772_s4 + $0x28] sm:$0xff] }
  0x2d   : > { %v562_v12 = vld [vmem:[%s4770_s2 + $0x1f8] sm:$0xff]  ;;  %v1098_v44 = vld [vmem:[%s4771_s3 + $0xa8] sm:$0xff]  ;;  %v2776_v49 = vpack.c.bf16 %v1368_v38, %v1366_v37  ;;  %v1370_v51 = vld [vmem:[%s4772_s4 + $0x20] sm:$0xff] }
  0x2e   : > { %v1096_v15 = vld [vmem:[%s4771_s3 + $0x98] sm:$0xff]  ;;  %v1372_v52 = vld [vmem:[%s4772_s4 + $0x30] sm:$0xff]  ;;  %v3381_v62 = vld [vmem:[%s3027_s21 + $0x48] sm:$0xff] }
  0x2f   : > { %2709 = vmatpush1.bf16.msra.mxu0 %v2708_v60  ;;  %2853 = vmatpush1.bf16.msra.mxu1 %v2708_v60  ;;  %v541_v60 = vld [vmem:[%s4770_s2 + $0x150] sm:$0xff]  ;;  %v1369_v24 = vld [vmem:[%s4772_s4 + $0x18] sm:$0xff]  ;;  %v2758_v25 = vpack.c.bf16 %v1096_v15, %v1094_v14 }
  0x30   : > { %2711 = vmatprep.subr.bf16.mxu1 %v2710_v61  ;;  %2743 = vmatprep.subr.bf16.mxu0 %v2742_v0  ;;  %v545_v61 = vld [vmem:[%s4770_s2 + $0x170] sm:$0xff]  ;;  %v2754_v0 = vpack.c.bf16 %v1092_v55, %v1090_v54  ;;  %v3322_v30 = vld [vmem:[%s3027_s21 + $0x38] sm:$0xff]  ;;  %v2774_v35 = vpack.c.bf16 %v1369_v24, %v1367_v23  ;;  %v1097_v54 = vld [vmem:[%s4771_s3 + $0xa0] sm:$0xff] }
  0x31   : > { %v2732_v5 = vpack.c.bf16 %v545_v61, %v541_v60  ;;  %v1099_v55 = vld [vmem:[%s4771_s3 + $0xb0] sm:$0xff]  ;;  %v1102_v60 = vld [vmem:[%s4771_s3 + $0xc8] sm:$0xff]  ;;  %v1104_v61 = vld [vmem:[%s4771_s3 + $0xd8] sm:$0xff] }
  0x32   : > { %628 = vmatmul.mubr.f32.vlgmr.msra.gmra.mrb[0].mxu0 %v3038_v29  ;;  %772 = vmatmul.mubr.f32.vlgmr.msra.gmra.mrb[0].mxu1 %v3133_v8  ;;  %v2764_v63 = vpack.c.bf16 %v1099_v55, %v1097_v54  ;;  %v3413_v14 = vld [vmem:[%s3027_s21 + $0x50] sm:$0xff]  ;;  %v1105_v23 = vld [vmem:[%s4771_s3 + $0xe0] sm:$0xff]  ;;  %v1391_v55 = vld [vmem:[%s4772_s4 + $0xc8] sm:$0xff] }
  0x33   : > { %2713 = vmatpush1.bf16.msra.mxu1 %v2712_v9  ;;  %633 = vmatprep.mubr.f32.mxu0 %v2912_v7  ;;  %v549_v9 = vld [vmem:[%s4770_s2 + $0x190] sm:$0xff] }
  0x34   : > { %777 = vmatprep.mubr.f32.mxu1 %v2912_v7  ;;  %2745 = vmatpush1.bf16.msra.mxu0 %v2744_v10  ;;  %v553_v10 = vld [vmem:[%s4770_s2 + $0x1b0] sm:$0xff] }
  0x35   : > { %2715 = vmatprep.subr.bf16.mxu1 %v2714_v13  ;;  %2747 = vmatprep.subr.bf16.mxu0 %v2746_v16  ;;  %v2756_v13 = vpack.c.bf16 %v1091_v2, %v1089_v1  ;;  %v3294_v16 = vld [vmem:[%s3027_s21 + $0x30] sm:$0xff]  ;;  %v2736_v18 = vpack.c.bf16 %v553_v10, %v549_v9  ;;  %v1379_v10 = vld [vmem:[%s4772_s4 + $0x68] sm:$0xff] }
  0x36   : > { %634 = vmatmul.mubr.f32.gmra.mrb[2].mxu0 %v3054_v36  ;;  %778 = vmatmul.mubr.f32.gmra.mrb[2].mxu1 %v3157_v19  ;;  %v1376_v1 = vld [vmem:[%s4772_s4 + $0x50] sm:$0xff] }
  0x37   : > { %2717 = vmatpush1.bf16.msra.mxu1 %v2716_v20  ;;  %639 = vmatprep.mubr.f32.mxu0 %v2912_v7  ;;  %v2738_v20 = vpack.c.bf16 %v562_v12, %v558_v11  ;;  %v1103_v9 = vld [vmem:[%s4771_s3 + $0xd0] sm:$0xff]  ;;  %v1381_v11 = vld [vmem:[%s4772_s4 + $0x78] sm:$0xff]  ;;  %v1106_v12 = vld [vmem:[%s4771_s3 + $0xe8] sm:$0xff] }
  0x38   : > { %783 = vmatprep.mubr.f32.mxu1 %v2912_v7  ;;  %2719 = vmatprep.subr.bf16.mxu1 %v2718_v21  ;;  %v557_v21 = vld [vmem:[%s4770_s2 + $0x1d0] sm:$0xff] }
  0x39   : > { %2749 = vmatpush1.bf16.msra.mxu0 %v2748_v26  ;;  %v1093_v26 = vld [vmem:[%s4771_s3 + $0x80] sm:$0xff]  ;;  %v1107_v24 = vld [vmem:[%s4771_s3 + $0xf0] sm:$0xff] }
  0x3a   : > { %640 = vmatmul.mubr.f32.gmra.mrb[4].mxu0 %v3182_v31  ;;  %784 = vmatmul.mubr.f32.gmra.mrb[4].mxu1 %v3185_v32  ;;  %v2760_v41 = vpack.c.bf16 %v1095_v28, %v1093_v26  ;;  %v1385_v26 = vld [vmem:[%s4772_s4 + $0x98] sm:$0xff]  ;;  %v1655_v28 = vld [vmem:[%s4773_s5] sm:$0xff]  ;;  %v2772_v38 = vpack.c.bf16 %v1107_v24, %v1105_v23  ;;  %v1388_v54 = vld [vmem:[%s4772_s4 + $0xb0] sm:$0xff] }
  0x3b   : > { %2721 = vmatpush1.bf16.msra.mxu1 %v2720_v33  ;;  %645 = vmatprep.mubr.f32.mxu0 %v2912_v7  ;;  %v3325_v33 = vld [vmem:[%s3027_s21 + $0xf8] sm:$0xff]  ;;  %v1657_v24 = vld [vmem:[%s4773_s5 + $0x10] sm:$0xff] }
  0x3c   : > { %789 = vmatprep.mubr.f32.mxu1 %v2912_v7  ;;  %2723 = vmatprep.subr.bf16.mxu1 %v2722_v34  ;;  %v2740_v34 = vpack.c.bf16 %v561_v22, %v557_v21  ;;  %v2786_v21 = vpack.c.bf16 %v1381_v11, %v1379_v10  ;;  %v1396_v10 = vld [vmem:[%s4772_s4 + $0xf0] sm:$0xff]  ;;  %v3517_v11 = vld [vmem:[%s3027_s21 + $0x78] sm:$0xff] }
  0x3d   : > { %2751 = vmatprep.subr.bf16.mxu0 %v2750_v40  ;;  %v1373_v40 = vld [vmem:[%s4772_s4 + $0x38] sm:$0xff] }
  0x3e   : > { %646 = vmatmul.mubr.f32.gmra.mrb[6].mxu0 %v3210_v45  ;;  %790 = vmatmul.mubr.f32.gmra.mrb[6].mxu1 %v3213_v46  ;;  %v2778_v50 = vpack.c.bf16 %v1373_v40, %v1371_v39  ;;  %v1382_v40 = vld [vmem:[%s4772_s4 + $0x80] sm:$0xff]  ;;  %v3573_v23 = vld [vmem:[%s3027_s21 + $0xb8] sm:$0xff] }
  0x3f   : > { %2725 = vmatpush1.bf16.msra.mxu1 %v2724_v47  ;;  %651 = vmatprep.mubr.f32.mxu0 %v2912_v7  ;;  %v1100_v47 = vld [vmem:[%s4771_s3 + $0xb8] sm:$0xff] }
  0x40   : > { %795 = vmatprep.mubr.f32.mxu1 %v2912_v7  ;;  %2727 = vmatprep.subr.bf16.mxu1 %v2726_v48  ;;  %v3350_v48 = vld [vmem:[%s3027_s21 + $0x40] sm:$0xff] }
  0x41   : > { %2753 = vmatpush1.bf16.msra.mxu0 %v2752_v53  ;;  %v2762_v53 = vpack.c.bf16 %v1100_v47, %v1098_v44  ;;  %v1387_v47 = vld [vmem:[%s4772_s4 + $0xa8] sm:$0xff] }
  0x42   : > { %652 = vmatmul.mubr.f32.gmra.mrb[8].mxu0 %v3238_v56  ;;  %796 = vmatmul.mubr.f32.gmra.mrb[8].mxu1 %v3241_v57 }
  0x43   : > { %2729 = vmatpush1.bf16.msra.mxu1 %v2728_v58  ;;  %657 = vmatprep.mubr.f32.mxu0 %v2912_v7  ;;  %v1375_v58 = vld [vmem:[%s4772_s4 + $0x48] sm:$0xff] }
  0x44   : > { %801 = vmatprep.mubr.f32.mxu1 %v2912_v7  ;;  %2731 = vmatprep.subr.bf16.mxu1 %v2730_v59  ;;  %v1377_v59 = vld [vmem:[%s4772_s4 + $0x58] sm:$0xff] }
  0x45   : > { %2755 = vmatprep.subr.bf16.mxu0 %v2754_v0  ;;  %v1374_v0 = vld [vmem:[%s4772_s4 + $0x40] sm:$0xff]  ;;  %v2782_v2 = vpack.c.bf16 %v1377_v59, %v1375_v58  ;;  %v1393_v58 = vld [vmem:[%s4772_s4 + $0xd8] sm:$0xff]  ;;  %v3485_v59 = vld [vmem:[%s3027_s21 + $0x68] sm:$0xff] }
  0x46   : > { %658 = vmatmul.mubr.f32.gmra.mrb[10].mxu0 %v3266_v3  ;;  %802 = vmatmul.mubr.f32.gmra.mrb[10].mxu1 %v3269_v4 }
  0x47   : > { %2733 = vmatpush1.bf16.msra.mxu1 %v2732_v5  ;;  %663 = vmatprep.mubr.f32.mxu0 %v2912_v7  ;;  %v2766_v5 = vpack.c.bf16 %v1104_v61, %v1102_v60  ;;  %v2798_v61 = vpack.c.bf16 %v1393_v58, %v1391_v55  ;;  %v1665_v55 = vld [vmem:[%s4773_s5 + $0x50] sm:$0xff]  ;;  %v1666_v58 = vld [vmem:[%s4773_s5 + $0x58] sm:$0xff] }
  0x48   : > { %807 = vmatprep.mubr.f32.mxu1 %v2912_v7  ;;  %2735 = vmatprep.subr.bf16.mxu1 %v2734_v6  ;;  %v1101_v6 = vld [vmem:[%s4771_s3 + $0xc0] sm:$0xff] }
  0x49   : > { %2757 = vmatpush1.bf16.msra.mxu0 %v2756_v13  ;;  %v1108_v13 = vld [vmem:[%s4771_s3 + $0xf8] sm:$0xff]  ;;  %v2768_v15 = vpack.c.bf16 %v1103_v9, %v1101_v6  ;;  %v1394_v9 = vld [vmem:[%s4772_s4 + $0xe0] sm:$0xff] }
  0x4a   : > { %664 = vmatmul.mubr.f32.gmra.mrb[12].mxu0 %v3294_v16  ;;  %808 = vmatmul.mubr.f32.gmra.mrb[12].mxu1 %v3297_v17  ;;  %v2770_v22 = vpack.c.bf16 %v1108_v13, %v1106_v12  ;;  %v2804_v12 = vpack.c.bf16 %v1396_v10, %v1394_v9  ;;  %v3524_v13 = vld [vmem:[%s3027_s21 + $0x80] sm:$0xff]  ;;  %v1669_v9 = vld [vmem:[%s4773_s5 + $0x70] sm:$0xff]  ;;  %v1670_v10 = vld [vmem:[%s4773_s5 + $0x78] sm:$0xff] }
  0x4b   : > { %2737 = vmatpush1.bf16.msra.mxu1 %v2736_v18  ;;  %669 = vmatprep.mubr.f32.mxu0 %v2912_v7  ;;  %v1378_v18 = vld [vmem:[%s4772_s4 + $0x60] sm:$0xff] }
  0x4c   : > { %813 = vmatprep.mubr.f32.mxu1 %v2912_v7  ;;  %2739 = vmatprep.subr.bf16.mxu1 %v2738_v20  ;;  %v1380_v20 = vld [vmem:[%s4772_s4 + $0x70] sm:$0xff] }
  0x4d   : > { %2759 = vmatprep.subr.bf16.mxu0 %v2758_v25  ;;  %v1383_v25 = vld [vmem:[%s4772_s4 + $0x88] sm:$0xff]  ;;  %v2788_v37 = vpack.c.bf16 %v1380_v20, %v1378_v18  ;;  %v3545_v18 = vld [vmem:[%s3027_s21 + $0x98] sm:$0xff]  ;;  %v3552_v20 = vld [vmem:[%s3027_s21 + $0xa0] sm:$0xff] }
  0x4e   : > { %670 = vmatmul.mubr.f32.gmra.mrb[14].mxu0 %v3322_v30  ;;  %814 = vmatmul.mubr.f32.gmra.mrb[14].mxu1 %v3325_v33  ;;  %v2790_v39 = vpack.c.bf16 %v1385_v26, %v1383_v25  ;;  %v1658_v25 = vld [vmem:[%s4773_s5 + $0x18] sm:$0xff]  ;;  %v3586_v26 = vadd.s32 8, %v3035_v27 }
  0x4f   : > { %2741 = vmatpush1.bf16.msra.mxu1 %v2740_v34  ;;  %675 = vmatprep.mubr.f32.mxu0 %v2912_v7  ;;  %v1656_v34 = vld [vmem:[%s4773_s5 + $0x8] sm:$0xff] }
  0x50   : > { %884 = vmatprep.mubr.f32.mxu1 %v2912_v7  ;;  %2775 = vmatprep.subr.bf16.mxu1 %v2774_v35  ;;  %v3444_v35 = vld [vmem:[%s3027_s21 + $0x58] sm:$0xff]  ;;  %v3452_v44 = vpack.c.bf16 %v1656_v34, %v1655_v28  ;;  %v2810_v28 = vpack.c.bf16 %v1658_v25, %v1657_v24  ;;  %v1659_v34 = vld [vmem:[%s4773_s5 + $0x20] sm:$0xff]  ;;  %vm395_vm1 = vcmp.lt.s32.totalorder %v3586_v26, 15  ;;  %v2834_v24 = vpack.c.bf16 %v1670_v10, %v1669_v9 }
  0x51   : > { %2761 = vmatpush1.bf16.msra.mxu0 %v2760_v41  ;;  %v1384_v41 = vld [vmem:[%s4772_s4 + $0x90] sm:$0xff] }
  0x52   : > { %676 = vmatmul.mubr.f32.gmra.mrb[16].mxu0 %v3350_v48  ;;  %885 = vmatmul.mubr.f32.vlgmr.msra.gmra.mrb[16].mxu1 %v3038_v29  ;;  %v2780_v29 = vpack.c.bf16 %v1372_v52, %v1370_v51  ;;  %v2792_v51 = vpack.c.bf16 %v1384_v41, %v1382_v40  ;;  %v1661_v40 = vld [vmem:[%s4773_s5 + $0x30] sm:$0xff]  ;;  %v1662_v41 = vld [vmem:[%s4773_s5 + $0x38] sm:$0xff] }
  0x53   : > { %2777 = vmatpush1.bf16.msra.mxu1 %v2776_v49  ;;  %681 = vmatprep.mubr.f32.mxu0 %v2912_v7  ;;  %v1389_v49 = vld [vmem:[%s4772_s4 + $0xb8] sm:$0xff] }
  0x54   : > { %890 = vmatprep.mubr.f32.mxu1 %v2912_v7  ;;  %2779 = vmatprep.subr.bf16.mxu1 %v2778_v50  ;;  %v3465_v50 = vld [vmem:[%s3027_s21 + $0x60] sm:$0xff]  ;;  %v2794_v52 = vpack.c.bf16 %v1389_v49, %v1387_v47  ;;  %v2818_v47 = vpack.c.bf16 %v1662_v41, %v1661_v40  ;;  %v1664_v49 = vld [vmem:[%s4773_s5 + $0x48] sm:$0xff] }
  0x55   : > { %2763 = vmatprep.subr.bf16.mxu0 %v2762_v53  ;;  %v1386_v53 = vld [vmem:[%s4772_s4 + $0xa0] sm:$0xff] }
  0x56   : > { %682 = vmatmul.mubr.f32.gmra.mrb[18].mxu0 %v3381_v62  ;;  %891 = vmatmul.mubr.f32.gmra.mrb[18].mxu1 %v3054_v36  ;;  %v2784_v36 = vpack.c.bf16 %v1376_v1, %v1374_v0  ;;  %v2796_v60 = vpack.c.bf16 %v1388_v54, %v1386_v53  ;;  %v1395_v0 = vld [vmem:[%s4772_s4 + $0xe8] sm:$0xff]  ;;  %v1397_v1 = vld [vmem:[%s4772_s4 + $0xf8] sm:$0xff]  ;;  %v414_v53 = vrot.slane %v3266_v3, 1 }
  0x57   : > { %687 = vmatprep.mubr.f32.mxu0 %v2912_v7  ;;  %896 = vmatprep.mubr.f32.mxu1 %v2912_v7  ;;  %v2802_v6 = vpack.c.bf16 %v1397_v1, %v1395_v0  ;;  %v399_v1 = vrot.slane %v3294_v16, 1 }
  0x58   : > { %2781 = vmatpush1.bf16.msra.mxu1 %v2780_v29  ;;  %2765 = vmatpush1.bf16.msra.mxu0 %v2764_v63  ;;  %v1390_v29 = vld [vmem:[%s4772_s4 + $0xc0] sm:$0xff]  ;;  %v1392_v63 = vld [vmem:[%s4772_s4 + $0xd0] sm:$0xff] }
  0x59   : > { %2783 = vmatprep.subr.bf16.mxu1 %v2782_v2  ;;  %2767 = vmatprep.subr.bf16.mxu0 %v2766_v5  ;;  %v3504_v2 = vld [vmem:[%s3027_s21 + $0x70] sm:$0xff]  ;;  %v2800_v5 = vpack.c.bf16 %v1392_v63, %v1390_v29  ;;  %v1667_v29 = vld [vmem:[%s4773_s5 + $0x60] sm:$0xff]  ;;  %v1668_v63 = vld [vmem:[%s4773_s5 + $0x68] sm:$0xff] }
  0x5a   : > { %688 = vmatmul.mubr.f32.gmra.mrb[20].mxu0 %v3413_v14  ;;  %897 = vmatmul.mubr.f32.gmra.mrb[20].mxu1 %v3182_v31 }
  0x5b   : > { %693 = vmatprep.mubr.f32.mxu0 %v2912_v7  ;;  %902 = vmatprep.mubr.f32.mxu1 %v2912_v7 }
  0x5c   : > { %2785 = vmatpush1.bf16.msra.mxu1 %v2784_v36  ;;  %2769 = vmatpush1.bf16.msra.mxu0 %v2768_v15  ;;  %v3531_v36 = vld [vmem:[%s3027_s21 + $0x88] sm:$0xff]  ;;  %v3538_v15 = vld [vmem:[%s3027_s21 + $0x90] sm:$0xff] }
  0x5d   : > { %2787 = vmatprep.subr.bf16.mxu1 %v2786_v21  ;;  %2771 = vmatprep.subr.bf16.mxu0 %v2770_v22  ;;  %v3559_v21 = vld [vmem:[%s3027_s21 + $0xa8] sm:$0xff]  ;;  %v3566_v22 = vld [vmem:[%s3027_s21 + $0xb0] sm:$0xff] }
  0x5e   : > { %694 = vmatmul.mubr.f32.gmra.mrb[22].mxu0 %v3444_v35  ;;  %903 = vmatmul.mubr.f32.gmra.mrb[22].mxu1 %v3210_v45  ;;  %v422_v10 = vrot.slane %v3559_v21, 1 }
  0x5f   : > { %699 = vmatprep.mubr.f32.mxu0 %v2912_v7  ;;  %908 = vmatprep.mubr.f32.mxu1 %v2912_v7 }
  0x60   : > { %2789 = vmatpush1.bf16.msra.mxu1 %v2788_v37  ;;  %2773 = vmatpush1.bf16.msra.mxu0 %v2772_v38  ;;  %v1660_v37 = vld [vmem:[%s4773_s5 + $0x28] sm:$0xff]  ;;  %v397_v38 = vrot.slane %v3182_v31, 1 }
  0x61   : > { %2791 = vmatprep.subr.bf16.mxu1 %v2790_v39  ;;  %2807 = vmatprep.subr.bf16.mxu0 %v3452_v44  ;;  %v413_v39 = vrot.slane %v3210_v45, 1 }
  0x62   : > { %700 = vmatmul.mubr.f32.gmra.mrb[24].mxu0 %v3465_v50  ;;  %909 = vmatmul.mubr.f32.gmra.mrb[24].mxu1 %v3238_v56 }
  0x63   : > { %705 = vmatprep.mubr.f32.mxu0 %v2912_v7  ;;  %914 = vmatprep.mubr.f32.mxu1 %v2912_v7 }
  0x64   : > { %2793 = vmatpush1.bf16.msra.mxu1 %v2792_v51  ;;  %v3630_v51 = vsel %vm428_vm0, %v413_v39, %v397_v38 }
  0x65   : > { %2795 = vmatprep.subr.bf16.mxu1 %v2794_v52  ;;  %v398_v52 = vrot.slane %v3238_v56, 1 }
  0x66   : > { %706 = vmatmul.mubr.f32.gmra.mrb[26].mxu0 %v3485_v59  ;;  %915 = vmatmul.mubr.f32.gmra.mrb[26].mxu1 %v3266_v3 }
  0x67   : > { %711 = vmatprep.mubr.f32.mxu0 %v2912_v7  ;;  %920 = vmatprep.mubr.f32.mxu1 %v2912_v7  ;;  %v3662_v0 = vsel %vm428_vm0, %v414_v53, %v398_v52 }
  0x68   : > { %2797 = vmatpush1.bf16.msra.mxu1 %v2796_v60  ;;  %v3648_v60 = vsel %vm428_vm0, %v398_v52, %v414_v53  ;;  %v403_v53 = vrot.slane %v3504_v2, 1 }
  0x69   : > { %2799 = vmatprep.subr.bf16.mxu1 %v2798_v61  ;;  %v2826_v61 = vpack.c.bf16 %v1666_v58, %v1665_v55 }
  0x6a   : > { %712 = vmatmul.mubr.f32.gmra.mrb[28].mxu0 %v3504_v2  ;;  %921 = vmatmul.mubr.f32.gmra.mrb[28].mxu1 %v3294_v16 }
  0x6b   : > { %717 = vmatprep.mubr.f32.mxu0 %v2912_v7  ;;  %926 = vmatprep.mubr.f32.mxu1 %v2912_v7 }
  0x6c   : > { %2801 = vmatpush1.bf16.msra.mxu1 %v2800_v5  ;;  %v415_v5 = vrot.slane %v3322_v30, 1 }
  0x6d   : > { %2803 = vmatprep.subr.bf16.mxu1 %v2802_v6  ;;  %v2830_v6 = vpack.c.bf16 %v1668_v63, %v1667_v29  ;;  %v420_v29 = vrot.slane %v3531_v36, 1 }
  0x6e   : > { %718 = vmatmul.mubr.f32.gmra.mrb[30].mxu0 %v3517_v11  ;;  %927 = vmatmul.mubr.f32.gmra.mrb[30].mxu1 %v3322_v30  ;;  %v3688_v25 = vsel %vm428_vm0, %v415_v5, %v399_v1 }
  0x6f   : > { %723 = vmatprep.mubr.f32.mxu0 %v2912_v7  ;;  %932 = vmatprep.mubr.f32.mxu1 %v2912_v7 }
  0x70   : > { %2805 = vmatpush1.bf16.msra.mxu1 %v2804_v12  ;;  %v3680_v12 = vsel %vm428_vm0, %v399_v1, %v415_v5  ;;  %v405_v5 = vrot.slane %v3538_v15, 1 }
  0x72   : > { %724 = vmatmul.mubr.f32.gmra.mrb[32].mxu0 %v3524_v13  ;;  %933 = vmatmul.mubr.f32.gmra.mrb[32].mxu1 %v3350_v48 }
  0x73   : > { %729 = vmatprep.mubr.f32.mxu0 %v2912_v7  ;;  %938 = vmatprep.mubr.f32.mxu1 %v2912_v7 }
  0x76   : > { %730 = vmatmul.mubr.f32.gmra.mrb[34].mxu0 %v3531_v36  ;;  %939 = vmatmul.mubr.f32.gmra.mrb[34].mxu1 %v3381_v62 }
  0x77   : > { %735 = vmatprep.mubr.f32.mxu0 %v2912_v7  ;;  %944 = vmatprep.mubr.f32.mxu1 %v2912_v7 }
  0x7a   : > { %736 = vmatmul.mubr.f32.gmra.mrb[36].mxu0 %v3538_v15  ;;  %945 = vmatmul.mubr.f32.gmra.mrb[36].mxu1 %v3413_v14 }
  0x7b   : > { %741 = vmatprep.mubr.f32.mxu0 %v2912_v7  ;;  %950 = vmatprep.mubr.f32.mxu1 %v2912_v7 }
  0x7e   : > { %742 = vmatmul.mubr.f32.gmra.mrb[38].mxu0 %v3545_v18  ;;  %951 = vmatmul.mubr.f32.gmra.mrb[38].mxu1 %v3444_v35 }
  0x7f   : > { %747 = vmatprep.mubr.f32.mxu0 %v2912_v7  ;;  %956 = vmatprep.mubr.f32.mxu1 %v2912_v7 }
  0x82   : > { %748 = vmatmul.mubr.f32.gmra.mrb[40].mxu0 %v3552_v20  ;;  %957 = vmatmul.mubr.f32.gmra.mrb[40].mxu1 %v3465_v50 }
  0x83   : > { %753 = vmatprep.mubr.f32.mxu0 %v2912_v7  ;;  %962 = vmatprep.mubr.f32.mxu1 %v2912_v7 }
  0x86   : > { %754 = vmatmul.mubr.f32.gmra.mrb[42].mxu0 %v3559_v21  ;;  %963 = vmatmul.mubr.f32.gmra.mrb[42].mxu1 %v3485_v59 }
  0x87   : > { %759 = vmatprep.mubr.f32.mxu0 %v2912_v7  ;;  %968 = vmatprep.mubr.f32.mxu1 %v2912_v7 }
  0x8a   : > { %760 = vmatmul.mubr.f32.gmra.mrb[44].mxu0 %v3566_v22  ;;  %969 = vmatmul.mubr.f32.gmra.mrb[44].mxu1 %v3504_v2 }
  0x8b   : > { %765 = vmatprep.mubr.f32.mxu0 %v2912_v7  ;;  %974 = vmatprep.mubr.f32.mxu1 %v2912_v7 }
  0x8e   : > { %766 = vmatmul.mubr.f32.gmra.mrb[46].mxu0 %v3573_v23  ;;  %975 = vmatmul.mubr.f32.gmra.mrb[46].mxu1 %v3517_v11 }
  0x8f   : > { %980 = vmatprep.mubr.f32.mxu1 %v2912_v7  ;;  %1173 = vmatprep.mubr.f32.mxu0 %v2912_v7 }
  0x92   : > { %981 = vmatmul.mubr.f32.gmra.mrb[48].mxu1 %v3524_v13  ;;  %1174 = vmatmul.mubr.f32.vlgmr.msra.gmra.mrb[48].mxu0 %v3066_v42  ;;  %v2814_v42 = vpack.c.bf16 %v1660_v37, %v1659_v34  ;;  %v416_v34 = vrot.slane %v3381_v62, 1 }
  0x93   : > { %986 = vmatprep.mubr.f32.mxu1 %v2912_v7  ;;  %1179 = vmatprep.mubr.f32.mxu0 %v2912_v7 }
  0x94   : > { %2809 = vmatpush3.bf16.msra.mxu0 %v3452_v44  ;;  %v3616_v44 = vsel %vm428_vm0, %v397_v38, %v413_v39  ;;  %v401_v39 = vrot.slane %v3413_v14, 1 }
  0x95   : > { %2811 = vmatprep.subr.bf16.mxu0 %v2810_v28 }
  0x96   : > { %987 = vmatmul.mubr.f32.gmra.mrb[50].mxu1 %v3531_v36  ;;  %2448 = vmatmul.mubr.msk.f32.gmra.mrb[50].mxu0 %vm395_vm1, %v3070_v43  ;;  %v1663_v43 = vld [vmem:[%s4773_s5 + $0x40] sm:$0xff] }
  0x97   : > { %992 = vmatprep.mubr.f32.mxu1 %v2912_v7  ;;  %1185 = vmatprep.mubr.f32.mxu0 %v2912_v7  ;;  %v2822_v54 = vpack.c.bf16 %v1664_v49, %v1663_v43  ;;  %v418_v43 = vrot.slane %v3485_v59, 1 }
  0x98   : > { %2813 = vmatpush3.bf16.msra.mxu0 %v2810_v28  ;;  %v400_v28 = vrot.slane %v3350_v48, 1 }
  0x99   : > { %2815 = vmatprep.subr.bf16.mxu0 %v2814_v42 }
  0x9a   : > { %993 = vmatmul.mubr.f32.gmra.mrb[52].mxu1 %v3538_v15  ;;  %1186 = vmatmul.mubr.f32.gmra.mrb[52].mxu0 %v3616_v44  ;;  %v3700_v37 = vsel %vm428_vm0, %v400_v28, %v416_v34  ;;  %v3708_v38 = vsel %vm428_vm0, %v416_v34, %v400_v28  ;;  %v423_v28 = vrot.slane %v3573_v23, 1 }
  0x9b   : > { %998 = vmatprep.mubr.f32.mxu1 %v2912_v7  ;;  %1191 = vmatprep.mubr.f32.mxu0 %v2912_v7 }
  0x9c   : > { %2817 = vmatpush3.bf16.msra.mxu0 %v2814_v42  ;;  %v417_v42 = vrot.slane %v3444_v35, 1 }
  0x9d   : > { %2819 = vmatprep.subr.bf16.mxu0 %v2818_v47 }
  0x9e   : > { %999 = vmatmul.mubr.f32.gmra.mrb[54].mxu1 %v3545_v18  ;;  %2449 = vmatmul.mubr.msk.f32.gmra.mrb[54].mxu0 %vm395_vm1, %v3630_v51  ;;  %v3720_v40 = vsel %vm428_vm0, %v401_v39, %v417_v42  ;;  %v3728_v41 = vsel %vm428_vm0, %v417_v42, %v401_v39  ;;  %v424_v39 = vrot.slane %v3157_v19, 1  ;;  %v427_v42 = vrot.slane %v3325_v33, 1 }
  0x9f   : > { %1004 = vmatprep.mubr.f32.mxu1 %v2912_v7  ;;  %1197 = vmatprep.mubr.f32.mxu0 %v2912_v7 }
  0xa0   : > { %2821 = vmatpush3.bf16.msra.mxu0 %v2818_v47  ;;  %v402_v47 = vrot.slane %v3465_v50, 1 }
  0xa1   : > { %2823 = vmatprep.subr.bf16.mxu0 %v2822_v54 }
  0xa2   : > { %1005 = vmatmul.mubr.f32.gmra.mrb[56].mxu1 %v3552_v20  ;;  %1198 = vmatmul.mubr.f32.gmra.mrb[56].mxu0 %v3648_v60  ;;  %v3740_v49 = vsel %vm428_vm0, %v402_v47, %v418_v43  ;;  %v3748_v52 = vsel %vm428_vm0, %v418_v43, %v402_v47 }
  0xa3   : > { %1010 = vmatprep.mubr.f32.mxu1 %v2912_v7  ;;  %1203 = vmatprep.mubr.f32.mxu0 %v2912_v7 }
  0xa4   : > { %2825 = vmatpush3.bf16.msra.mxu0 %v2822_v54  ;;  %v419_v54 = vrot.slane %v3517_v11, 1 }
  0xa5   : > { %2827 = vmatprep.subr.bf16.mxu0 %v2826_v61 }
  0xa6   : > { %1011 = vmatmul.mubr.f32.gmra.mrb[58].mxu1 %v3559_v21  ;;  %2450 = vmatmul.mubr.msk.f32.gmra.mrb[58].mxu0 %vm395_vm1, %v3662_v0  ;;  %v3760_v55 = vsel %vm428_vm0, %v403_v53, %v419_v54  ;;  %v3768_v58 = vsel %vm428_vm0, %v419_v54, %v403_v53 }
  0xa7   : > { %1016 = vmatprep.mubr.f32.mxu1 %v2912_v7  ;;  %1209 = vmatprep.mubr.f32.mxu0 %v2912_v7 }
  0xa8   : > { %2829 = vmatpush3.bf16.msra.mxu0 %v2826_v61  ;;  %v404_v61 = vrot.slane %v3524_v13, 1 }
  0xa9   : > { %2831 = vmatprep.subr.bf16.mxu0 %v2830_v6 }
  0xaa   : > { %1017 = vmatmul.mubr.f32.gmra.mrb[60].mxu1 %v3566_v22  ;;  %1210 = vmatmul.mubr.f32.gmra.mrb[60].mxu0 %v3680_v12  ;;  %v3780_v63 = vsel %vm428_vm0, %v404_v61, %v420_v29  ;;  %v3788_v1 = vsel %vm428_vm0, %v420_v29, %v404_v61 }
  0xab   : > { %1022 = vmatprep.mubr.f32.mxu1 %v2912_v7  ;;  %1215 = vmatprep.mubr.f32.mxu0 %v2912_v7 }
  0xac   : > { %2833 = vmatpush3.bf16.msra.mxu0 %v2830_v6  ;;  %v421_v6 = vrot.slane %v3545_v18, 1 }
  0xad   : > { %2835 = vmatprep.subr.bf16.mxu0 %v2834_v24 }
  0xae   : > { %1023 = vmatmul.mubr.f32.gmra.mrb[62].mxu1 %v3573_v23  ;;  %2451 = vmatmul.mubr.msk.f32.gmra.mrb[62].mxu0 %vm395_vm1, %v3688_v25  ;;  %v3808_v9 = vsel %vm428_vm0, %v421_v6, %v405_v5 }
  0xaf   : > { %1028 = vmatprep.mubr.f32.mxu1 %v2912_v7  ;;  %1221 = vmatprep.mubr.f32.mxu0 %v2912_v7 }
  0xb0   : > { %2837 = vmatpush3.bf16.msra.mxu0 %v2834_v24 }
  0xb2   : > { %1029 = vmatmul.mubr.f32.gmra.mrb[64].mxu1 %v3133_v8  ;;  %1222 = vmatmul.mubr.f32.gmra.mrb[64].mxu0 %v3700_v37 }
  0xb3   : > { %1034 = vmatprep.mubr.f32.mxu1 %v2912_v7  ;;  %1227 = vmatprep.mubr.f32.mxu0 %v2912_v7 }
  0xb6   : > { %1035 = vmatmul.mubr.f32.gmra.mrb[66].mxu1 %v3157_v19  ;;  %2452 = vmatmul.mubr.msk.f32.gmra.mrb[66].mxu0 %vm395_vm1, %v3708_v38  ;;  %v409_v19 = vrot.slane %v3185_v32, 1 }
  0xb7   : > { %1040 = vmatprep.mubr.f32.mxu1 %v2912_v7  ;;  %1233 = vmatprep.mubr.f32.mxu0 %v2912_v7 }
  0xba   : > { %1041 = vmatmul.mubr.f32.gmra.mrb[68].mxu1 %v3185_v32  ;;  %1234 = vmatmul.mubr.f32.gmra.mrb[68].mxu0 %v3720_v40 }
  0xbb   : > { %1046 = vmatprep.mubr.f32.mxu1 %v2912_v7  ;;  %1239 = vmatprep.mubr.f32.mxu0 %v2912_v7 }
  0xbe   : > { %1047 = vmatmul.mubr.f32.gmra.mrb[70].mxu1 %v3213_v46  ;;  %2453 = vmatmul.mubr.msk.f32.gmra.mrb[70].mxu0 %vm395_vm1, %v3728_v41 }
  0xbf   : > { %1052 = vmatprep.mubr.f32.mxu1 %v2912_v7  ;;  %1245 = vmatprep.mubr.f32.mxu0 %v2912_v7 }
  0xc2   : > { %1053 = vmatmul.mubr.f32.gmra.mrb[72].mxu1 %v3241_v57  ;;  %1246 = vmatmul.mubr.f32.gmra.mrb[72].mxu0 %v3740_v49 }
  0xc3   : > { %1058 = vmatprep.mubr.f32.mxu1 %v2912_v7  ;;  %1251 = vmatprep.mubr.f32.mxu0 %v2912_v7 }
  0xc6   : > { %1059 = vmatmul.mubr.f32.gmra.mrb[74].mxu1 %v3269_v4  ;;  %2454 = vmatmul.mubr.msk.f32.gmra.mrb[74].mxu0 %vm395_vm1, %v3748_v52 }
  0xc7   : > { %1064 = vmatprep.mubr.f32.mxu1 %v2912_v7  ;;  %1257 = vmatprep.mubr.f32.mxu0 %v2912_v7 }
  0xca   : > { %1065 = vmatmul.mubr.f32.gmra.mrb[76].mxu1 %v3297_v17  ;;  %1258 = vmatmul.mubr.f32.gmra.mrb[76].mxu0 %v3760_v55 }
  0xcb   : > { %1070 = vmatprep.mubr.f32.mxu1 %v2912_v7  ;;  %1263 = vmatprep.mubr.f32.mxu0 %v2912_v7 }
  0xce   : > { %1071 = vmatmul.mubr.f32.gmra.mrb[78].mxu1 %v3325_v33  ;;  %2455 = vmatmul.mubr.msk.f32.gmra.mrb[78].mxu0 %vm395_vm1, %v3768_v58 }
  0xcf   : > { %1269 = vmatprep.mubr.f32.mxu0 %v2912_v7  ;;  %1462 = vmatprep.mubr.f32.mxu1 %v2912_v7 }
  0xd2   : > { %1270 = vmatmul.mubr.f32.gmra.mrb[80].mxu0 %v3780_v63  ;;  %1463 = vmatmul.mubr.f32.vlgmr.msra.gmra.mrb[80].mxu1 %v3182_v31  ;;  %v3800_v31 = vsel %vm428_vm0, %v405_v5, %v421_v6 }
  0xd3   : > { %1275 = vmatprep.mubr.f32.mxu0 %v2912_v7  ;;  %1468 = vmatprep.mubr.f32.mxu1 %v2912_v7 }
  0xd6   : > { %2456 = vmatmul.mubr.msk.f32.gmra.mrb[82].mxu0 %vm395_vm1, %v3788_v1  ;;  %1469 = vmatmul.mubr.f32.gmra.mrb[82].mxu1 %v3210_v45  ;;  %v406_v45 = vrot.slane %v3552_v20, 1 }
  0xd7   : > { %1281 = vmatprep.mubr.f32.mxu0 %v2912_v7  ;;  %1474 = vmatprep.mubr.f32.mxu1 %v2912_v7 }
  0xd8   : > { %v3828_v24 = vsel %vm428_vm0, %v422_v10, %v406_v45 }
  0xda   : > { %1282 = vmatmul.mubr.f32.gmra.mrb[84].mxu0 %v3800_v31  ;;  %1475 = vmatmul.mubr.f32.gmra.mrb[84].mxu1 %v3238_v56  ;;  %v3820_v56 = vsel %vm428_vm0, %v406_v45, %v422_v10 }
  0xdb   : > { %1287 = vmatprep.mubr.f32.mxu0 %v2912_v7  ;;  %1480 = vmatprep.mubr.f32.mxu1 %v2912_v7 }
  0xde   : > { %2457 = vmatmul.mubr.msk.f32.gmra.mrb[86].mxu0 %vm395_vm1, %v3808_v9  ;;  %1481 = vmatmul.mubr.f32.gmra.mrb[86].mxu1 %v3266_v3  ;;  %v407_v3 = vrot.slane %v3566_v22, 1 }
  0xdf   : > { %1293 = vmatprep.mubr.f32.mxu0 %v2912_v7  ;;  %1486 = vmatprep.mubr.f32.mxu1 %v2912_v7 }
  0xe0   : > { %v3848_v34 = vsel %vm428_vm0, %v423_v28, %v407_v3 }
  0xe2   : > { %1294 = vmatmul.mubr.f32.gmra.mrb[88].mxu0 %v3820_v56  ;;  %1487 = vmatmul.mubr.f32.gmra.mrb[88].mxu1 %v3294_v16  ;;  %v3840_v16 = vsel %vm428_vm0, %v407_v3, %v423_v28 }
  0xe3   : > { %1299 = vmatprep.mubr.f32.mxu0 %v2912_v7  ;;  %1492 = vmatprep.mubr.f32.mxu1 %v2912_v7 }
  0xe6   : > { %2458 = vmatmul.mubr.msk.f32.gmra.mrb[90].mxu0 %vm395_vm1, %v3828_v24  ;;  %1493 = vmatmul.mubr.f32.gmra.mrb[90].mxu1 %v3322_v30  ;;  %v408_v30 = vrot.slane %v3133_v8, 1 }
  0xe7   : > { %1305 = vmatprep.mubr.f32.mxu0 %v2912_v7  ;;  %1498 = vmatprep.mubr.f32.mxu1 %v2912_v7 }
  0xe8   : > { %v3868_v8 = vsel %vm428_vm0, %v424_v39, %v408_v30 }
  0xea   : > { %1306 = vmatmul.mubr.f32.gmra.mrb[92].mxu0 %v3840_v16  ;;  %1499 = vmatmul.mubr.f32.gmra.mrb[92].mxu1 %v3350_v48  ;;  %v3860_v48 = vsel %vm428_vm0, %v408_v30, %v424_v39 }
  0xeb   : > { %1311 = vmatprep.mubr.f32.mxu0 %v2912_v7  ;;  %1504 = vmatprep.mubr.f32.mxu1 %v2912_v7 }
  0xee   : > { %2459 = vmatmul.mubr.msk.f32.gmra.mrb[94].mxu0 %vm395_vm1, %v3848_v34  ;;  %1505 = vmatmul.mubr.f32.gmra.mrb[94].mxu1 %v3381_v62  ;;  %v425_v62 = vrot.slane %v3213_v46, 1  ;;  %v410_v46 = vrot.slane %v3241_v57, 1  ;;  %v3908_v57 = vld [vmem:[%s4774_s6] ss:$0 sm:$0xff] }
  0xef   : > { %1317 = vmatprep.mubr.f32.mxu0 %v2912_v7  ;;  %1510 = vmatprep.mubr.f32.mxu1 %v2912_v7 }
  0xf0   : > { %v3888_v32 = vsel %vm428_vm0, %v425_v62, %v409_v19 }
  0xf2   : > { %1318 = vmatmul.mubr.f32.gmra.mrb[96].mxu0 %v3860_v48  ;;  %1511 = vmatmul.mubr.f32.gmra.mrb[96].mxu1 %v3413_v14  ;;  %v3880_v14 = vsel %vm428_vm0, %v409_v19, %v425_v62 }
  0xf3   : > { %1323 = vmatprep.mubr.f32.mxu0 %v2912_v7  ;;  %1516 = vmatprep.mubr.f32.mxu1 %v2912_v7 }
  0xf6   : > { %2460 = vmatmul.mubr.msk.f32.gmra.mrb[98].mxu0 %vm395_vm1, %v3868_v8  ;;  %1517 = vmatmul.mubr.f32.gmra.mrb[98].mxu1 %v3444_v35  ;;  %v426_v35 = vrot.slane %v3269_v4, 1 }
  0xf7   : > { %1329 = vmatprep.mubr.f32.mxu0 %v2912_v7  ;;  %1522 = vmatprep.mubr.f32.mxu1 %v2912_v7 }
  0xf8   : > { %v3914_v4 = vsel %vm428_vm0, %v426_v35, %v410_v46 }
  0xfa   : > { %1330 = vmatmul.mubr.f32.gmra.mrb[100].mxu0 %v3880_v14  ;;  %1523 = vmatmul.mubr.f32.gmra.mrb[100].mxu1 %v3465_v50  ;;  %v3900_v50 = vsel %vm428_vm0, %v410_v46, %v426_v35 }
  0xfb   : > { %1335 = vmatprep.mubr.f32.mxu0 %v2912_v7  ;;  %1528 = vmatprep.mubr.f32.mxu1 %v2912_v7 }
  0xfe   : > { %2461 = vmatmul.mubr.msk.f32.gmra.mrb[102].mxu0 %vm395_vm1, %v3888_v32  ;;  %1529 = vmatmul.mubr.f32.gmra.mrb[102].mxu1 %v3485_v59  ;;  %v411_v59 = vrot.slane %v3297_v17, 1 }
  0xff   : > { %1341 = vmatprep.mubr.f32.mxu0 %v2912_v7  ;;  %1534 = vmatprep.mubr.f32.mxu1 %v2912_v7 }
 0x100   : > { %v3937_v54 = vsel %vm428_vm0, %v411_v59, %v427_v42  ;;  %v3953_v10 = vsel %vm428_vm0, %v427_v42, %v411_v59 }
 0x102   : > { %1342 = vmatmul.mubr.f32.gmra.mrb[104].mxu0 %v3900_v50  ;;  %1535 = vmatmul.mubr.f32.gmra.mrb[104].mxu1 %v3504_v2 }
 0x103   : > { %1347 = vmatprep.mubr.f32.mxu0 %v2912_v7  ;;  %1540 = vmatprep.mubr.f32.mxu1 %v2912_v7 }
 0x105   : > { %v773_v2 = vpop.f32.mrb[0].mxu1  ;;  %v629_v47 = vpop.f32.mrb[0].mxu0 }
 0x106   : > { %v1927_v43 = vadd.f32 %v3908_v57, %v773_v2  ;;  %v3924_v53 = vpop.f32.mrb[1].mxu1  ;;  %2462 = vmatmul.mubr.msk.f32.gmra.mrb[106].mxu0 %vm395_vm1, %v3914_v4  ;;  %1541 = vmatmul.mubr.f32.gmra.mrb[106].mxu1 %v3517_v11  ;;  %v1903_v17 = vadd.f32 %v3908_v57, %v629_v47  ;;  %v3931_v33 = vpop.f32.mrb[1].mxu0 }
 0x107   : > { %1353 = vmatprep.mubr.f32.mxu0 %v2912_v7  ;;  %1546 = vmatprep.mubr.f32.mxu1 %v2912_v7 }
 0x108   : > { %2215 = vst [vmem:[%s3921_s12 + $0x300] sm:$0xff] %v1927_v43  ;;  %2191 = vst [vmem:[%s3921_s12] sm:$0xff] %v1903_v17 }
 0x109   : > { %v779_v61 = vpop.f32.mrb[2].mxu1  ;;  %v635_v29 = vpop.f32.mrb[2].mxu0 }
 0x10a   : > { %v1928_v11 = vadd.f32 %v3908_v57, %v779_v61  ;;  %v3942_v5 = vpop.f32.mrb[3].mxu1  ;;  %1354 = vmatmul.mubr.f32.gmra.mrb[108].mxu0 %v3937_v54  ;;  %1547 = vmatmul.mubr.f32.gmra.mrb[108].mxu1 %v3524_v13  ;;  %v1904_v6 = vadd.f32 %v3908_v57, %v635_v29  ;;  %v3947_v45 = vpop.f32.mrb[3].mxu0 }
 0x10b   : > { %1359 = vmatprep.mubr.f32.mxu0 %v2912_v7  ;;  %1552 = vmatprep.mubr.f32.mxu1 %v2912_v7 }
 0x10c   : > { %2216 = vst [vmem:[%s3921_s12 + $0x310] sm:$0xff] %v1928_v11  ;;  %2192 = vst [vmem:[%s3921_s12 + $0x10] sm:$0xff] %v1904_v6 }
 0x10d   : > { %v785_v3 = vpop.f32.mrb[4].mxu1  ;;  %v641_v28 = vpop.f32.mrb[4].mxu0 }
 0x10e   : > { %v1929_v13 = vadd.f32 %v3908_v57, %v785_v3  ;;  %v3958_v30 = vpop.f32.mrb[5].mxu1  ;;  %2463 = vmatmul.mubr.msk.f32.gmra.mrb[110].mxu0 %vm395_vm1, %v3953_v10  ;;  %1553 = vmatmul.mubr.f32.gmra.mrb[110].mxu1 %v3531_v36  ;;  %v1905_v39 = vadd.f32 %v3908_v57, %v641_v28  ;;  %v3965_v19 = vpop.f32.mrb[5].mxu0 }
 0x10f   : > { %4776 = vst [vmem:[#allocation2_spill] sm:$0xff] %v3958_v30  ;;  %1558 = vmatprep.mubr.f32.mxu1 %v2912_v7  ;;  %2630 = vmatprep.mubr.f32.mxu0 %v3616_v44 }
 0x110   : > { %2217 = vst [vmem:[%s3921_s12 + $0x340] sm:$0xff] %v1929_v13  ;;  %2193 = vst [vmem:[%s3921_s12 + $0x40] sm:$0xff] %v1905_v39 }
 0x111   : > { %v791_v62 = vpop.f32.mrb[6].mxu1  ;;  %v647_v46 = vpop.f32.mrb[6].mxu0 }
 0x112   : > { %v1930_v35 = vadd.f32 %v3908_v57, %v791_v62  ;;  %v3972_v59 = vpop.f32.mrb[7].mxu1  ;;  %1559 = vmatmul.mubr.f32.gmra.mrb[112].mxu1 %v3538_v15  ;;  %2631 = vmatmul.mubr.msk.f32.vlgmr.msra.gmra.mrb[112].mxu0 %vm395_vm1, %v3630_v51  ;;  %v1906_v36 = vadd.f32 %v3908_v57, %v647_v46  ;;  %v3979_v42 = vpop.f32.mrb[7].mxu0 }
 0x113   : > { %4777 = vst [vmem:[#allocation3_spill] sm:$0xff] %v3972_v59  ;;  %1564 = vmatprep.mubr.f32.mxu1 %v2912_v7  ;;  %2633 = vmatprep.mubr.f32.mxu0 %v3648_v60 }
 0x114   : > { %2218 = vst [vmem:[%s3921_s12 + $0x350] sm:$0xff] %v1930_v35  ;;  %2194 = vst [vmem:[%s3921_s12 + $0x50] sm:$0xff] %v1906_v36 }
 0x115   : > { %v797_v44 = vpop.f32.mrb[8].mxu1  ;;  %v653_v2 = vpop.f32.mrb[8].mxu0 }
 0x116   : > { %v1931_v15 = vadd.f32 %v3908_v57, %v797_v44  ;;  %v3986_v47 = vpop.f32.mrb[9].mxu1  ;;  %1565 = vmatmul.mubr.f32.gmra.mrb[114].mxu1 %v3545_v18  ;;  %2634 = vmatmul.mubr.msk.f32.gmra.mrb[114].mxu0 %vm395_vm1, %v3662_v0  ;;  %v1907_v51 = vadd.f32 %v3908_v57, %v653_v2  ;;  %v3993_v43 = vpop.f32.mrb[9].mxu0 }
 0x117   : > { %4778 = vst [vmem:[#allocation4_spill] sm:$0xff] %v3986_v47  ;;  %1570 = vmatprep.mubr.f32.mxu1 %v2912_v7  ;;  %2636 = vmatprep.mubr.f32.mxu0 %v3680_v12 }
 0x118   : > { %2219 = vst [vmem:[%s3921_s12 + $0x380] sm:$0xff] %v1931_v15  ;;  %2195 = vst [vmem:[%s3921_s12 + $0x80] sm:$0xff] %v1907_v51  ;;  %v2880_v51 = vld [vmem:[%s3027_s21 + $0xc8] sm:$0xff] }
 0x119   : > { %v803_v60 = vpop.f32.mrb[10].mxu1  ;;  %v659_v17 = vpop.f32.mrb[10].mxu0 }
 0x11a   : > { %v1932_v18 = vadd.f32 %v3908_v57, %v803_v60  ;;  %v4000_v61 = vpop.f32.mrb[11].mxu1  ;;  %1571 = vmatmul.mubr.f32.gmra.mrb[116].mxu1 %v3552_v20  ;;  %2637 = vmatmul.mubr.msk.f32.gmra.mrb[116].mxu0 %vm395_vm1, %v3688_v25  ;;  %v1908_v0 = vadd.f32 %v3908_v57, %v659_v17  ;;  %v4007_v29 = vpop.f32.mrb[11].mxu0 }
 0x11b   : > { %4779 = vst [vmem:[#allocation5_spill] sm:$0xff] %v4000_v61  ;;  %1576 = vmatprep.mubr.f32.mxu1 %v2912_v7  ;;  %2639 = vmatprep.mubr.f32.mxu0 %v3700_v37 }
 0x11c   : > { %2220 = vst [vmem:[%s3921_s12 + $0x390] sm:$0xff] %v1932_v18  ;;  %2196 = vst [vmem:[%s3921_s12 + $0x90] sm:$0xff] %v1908_v0  ;;  %v2881_v0 = vld [vmem:[%s3027_s21 + $0xd0] sm:$0xff] }
 0x11d   : > { %v809_v12 = vpop.f32.mrb[12].mxu1  ;;  %v665_v11 = vpop.f32.mrb[12].mxu0 }
 0x11e   : > { %v1933_v20 = vadd.f32 %v3908_v57, %v809_v12  ;;  %v4014_v6 = vpop.f32.mrb[13].mxu1  ;;  %1577 = vmatmul.mubr.f32.gmra.mrb[118].mxu1 %v3559_v21  ;;  %2640 = vmatmul.mubr.msk.f32.gmra.mrb[118].mxu0 %vm395_vm1, %v3708_v38  ;;  %v1909_v25 = vadd.f32 %v3908_v57, %v665_v11  ;;  %v4021_v3 = vpop.f32.mrb[13].mxu0 }
 0x11f   : > { %4780 = vst [vmem:[#allocation6_spill] sm:$0xff] %v4014_v6  ;;  %1582 = vmatprep.mubr.f32.mxu1 %v2912_v7  ;;  %2642 = vmatprep.mubr.f32.mxu0 %v3720_v40 }
 0x120   : > { %2221 = vst [vmem:[%s3921_s12 + $0x3c0] sm:$0xff] %v1933_v20  ;;  %2197 = vst [vmem:[%s3921_s12 + $0xc0] sm:$0xff] %v1909_v25  ;;  %v2882_v25 = vld [vmem:[%s3027_s21 + $0xd8] sm:$0xff] }
 0x121   : > { %v815_v37 = vpop.f32.mrb[14].mxu1  ;;  %v671_v28 = vpop.f32.mrb[14].mxu0 }
 0x122   : > { %v1934_v21 = vadd.f32 %v3908_v57, %v815_v37  ;;  %v4028_v13 = vpop.f32.mrb[15].mxu1  ;;  %1583 = vmatmul.mubr.f32.gmra.mrb[120].mxu1 %v3566_v22  ;;  %2643 = vmatmul.mubr.msk.f32.gmra.mrb[120].mxu0 %vm395_vm1, %v3728_v41  ;;  %v1910_v38 = vadd.f32 %v3908_v57, %v671_v28  ;;  %v4035_v39 = vpop.f32.mrb[15].mxu0 }
 0x123   : > { %4781 = vst [vmem:[#allocation7_spill] sm:$0xff] %v4028_v13  ;;  %1588 = vmatprep.mubr.f32.mxu1 %v2912_v7  ;;  %2645 = vmatprep.mubr.f32.mxu0 %v3740_v49 }
 0x124   : > { %2222 = vst [vmem:[%s3921_s12 + $0x3d0] sm:$0xff] %v1934_v21  ;;  %2198 = vst [vmem:[%s3921_s12 + $0xd0] sm:$0xff] %v1910_v38  ;;  %v2883_v38 = vld [vmem:[%s3027_s21 + $0xe0] sm:$0xff] }
 0x125   : > { %v4041_v40 = vpop.f32.mrb[16].mxu1  ;;  %v677_v62 = vpop.f32.mrb[16].mxu0 }
 0x126   : > { %v4043_v22 = vpop.f32.mrb[17].mxu1  ;;  %1589 = vmatmul.mubr.f32.gmra.mrb[122].mxu1 %v3573_v23  ;;  %2646 = vmatmul.mubr.msk.f32.gmra.mrb[122].mxu0 %vm395_vm1, %v3748_v52  ;;  %v1911_v41 = vadd.f32 %v3908_v57, %v677_v62  ;;  %v4050_v46 = vpop.f32.mrb[17].mxu0  ;;  %v2879_v23 = vld [vmem:[%s3027_s21 + $0xc0] sm:$0xff] }
 0x127   : > { %1594 = vmatprep.mubr.f32.mxu1 %v2912_v7  ;;  %2648 = vmatprep.mubr.f32.mxu0 %v3760_v55 }
 0x128   : > { %2199 = vst [vmem:[%s3921_s12 + $0x100] sm:$0xff] %v1911_v41 }
 0x129   : > { %v4055_v49 = vpop.f32.mrb[18].mxu1  ;;  %v683_v35 = vpop.f32.mrb[18].mxu0 }
 0x12a   : > { %v4057_v36 = vpop.f32.mrb[19].mxu1  ;;  %1595 = vmatmul.mubr.f32.gmra.mrb[124].mxu1 %v2879_v23  ;;  %2649 = vmatmul.mubr.msk.f32.gmra.mrb[124].mxu0 %vm395_vm1, %v3768_v58  ;;  %v1912_v52 = vadd.f32 %v3908_v57, %v683_v35  ;;  %v4064_v44 = vpop.f32.mrb[19].mxu0  ;;  %v2884_v23 = vld [vmem:[%s3027_s21 + $0xe8] sm:$0xff] }
 0x12b   : > { %1600 = vmatprep.mubr.f32.mxu1 %v2912_v7  ;;  %2651 = vmatprep.mubr.f32.mxu0 %v3780_v63 }
 0x12c   : > { %2200 = vst [vmem:[%s3921_s12 + $0x110] sm:$0xff] %v1912_v52 }
 0x12d   : > { %v4069_v55 = vpop.f32.mrb[20].mxu1  ;;  %v689_v2 = vpop.f32.mrb[20].mxu0 }
 0x12e   : > { %v4071_v15 = vpop.f32.mrb[21].mxu1  ;;  %1601 = vmatmul.mubr.f32.gmra.mrb[126].mxu1 %v2880_v51  ;;  %2652 = vmatmul.mubr.msk.f32.gmra.mrb[126].mxu0 %vm395_vm1, %v3788_v1  ;;  %v1913_v58 = vadd.f32 %v3908_v57, %v689_v2  ;;  %v4078_v60 = vpop.f32.mrb[21].mxu0  ;;  %v389_v51 = vld [vmem:[%s345_s24] sm:$0xff] }
 0x12f   : > { %1606 = vmatprep.mubr.f32.mxu1 %v2912_v7  ;;  %2654 = vmatprep.mubr.f32.mxu0 %v3800_v31 }
 0x130   : > { %2201 = vst [vmem:[%s3921_s12 + $0x140] sm:$0xff] %v1913_v58 }
 0x131   : > { %v4083_v63 = vpop.f32.mrb[22].mxu1  ;;  %v695_v17 = vpop.f32.mrb[22].mxu0 }
 0x132   : > { %v4085_v18 = vpop.f32.mrb[23].mxu1  ;;  %1607 = vmatmul.mubr.f32.gmra.mrb[128].mxu1 %v2881_v0  ;;  %2655 = vmatmul.mubr.msk.f32.gmra.mrb[128].mxu0 %vm395_vm1, %v3808_v9  ;;  %v1914_v1 = vadd.f32 %v3908_v57, %v695_v17  ;;  %v4092_v12 = vpop.f32.mrb[23].mxu0  ;;  %v2885_v17 = vld [vmem:[%s3027_s21 + $0xf0] sm:$0xff] }
 0x133   : > { %1612 = vmatprep.mubr.f32.mxu1 %v2912_v7  ;;  %2657 = vmatprep.mubr.f32.mxu0 %v3820_v56 }
 0x134   : > { %2202 = vst [vmem:[%s3921_s12 + $0x150] sm:$0xff] %v1914_v1 }
 0x135   : > { %v4097_v31 = vpop.f32.mrb[24].mxu1  ;;  %v701_v11 = vpop.f32.mrb[24].mxu0 }
 0x136   : > { %v4099_v20 = vpop.f32.mrb[25].mxu1  ;;  %1613 = vmatmul.mubr.f32.gmra.mrb[130].mxu1 %v2882_v25  ;;  %2658 = vmatmul.mubr.msk.f32.gmra.mrb[130].mxu0 %vm395_vm1, %v3828_v24  ;;  %v1915_v9 = vadd.f32 %v3908_v57, %v701_v11  ;;  %v4106_v37 = vpop.f32.mrb[25].mxu0 }
 0x137   : > { %1618 = vmatprep.mubr.f32.mxu1 %v2912_v7  ;;  %2660 = vmatprep.mubr.f32.mxu0 %v3840_v16 }
 0x138   : > { %2203 = vst [vmem:[%s3921_s12 + $0x180] sm:$0xff] %v1915_v9 }
 0x139   : > { %v4111_v56 = vpop.f32.mrb[26].mxu1  ;;  %v707_v28 = vpop.f32.mrb[26].mxu0 }
 0x13a   : > { %v4113_v21 = vpop.f32.mrb[27].mxu1  ;;  %1619 = vmatmul.mubr.f32.gmra.mrb[132].mxu1 %v2883_v38  ;;  %2661 = vmatmul.mubr.msk.f32.gmra.mrb[132].mxu0 %vm395_vm1, %v3848_v34  ;;  %v1916_v24 = vadd.f32 %v3908_v57, %v707_v28  ;;  %v4120_v62 = vpop.f32.mrb[27].mxu0  ;;  %v2886_v38 = vld [vmem:[%s3027_s21 + $0xf8] sm:$0xff] }
 0x13b   : > { %1624 = vmatprep.mubr.f32.mxu1 %v2912_v7  ;;  %2663 = vmatprep.mubr.f32.mxu0 %v3860_v48 }
 0x13c   : > { %2204 = vst [vmem:[%s3921_s12 + $0x190] sm:$0xff] %v1916_v24 }
 0x13d   : > { %v4126_v16 = vpop.f32.mrb[28].mxu1  ;;  %v713_v41 = vpop.f32.mrb[28].mxu0 }
 0x13e   : > { %v4128_v35 = vpop.f32.mrb[29].mxu1  ;;  %1625 = vmatmul.mubr.f32.gmra.mrb[134].mxu1 %v2884_v23  ;;  %2664 = vmatmul.mubr.msk.f32.gmra.mrb[134].mxu0 %vm395_vm1, %v3868_v8  ;;  %v1917_v34 = vadd.f32 %v3908_v57, %v713_v41  ;;  %v4135_v52 = vpop.f32.mrb[29].mxu0  ;;  %v390_v8 = vld [vmem:[%s345_s24 + $0x8] sm:$0xff] }
 0x13f   : > { %1630 = vmatprep.mubr.f32.mxu1 %v2912_v7  ;;  %2666 = vmatprep.mubr.f32.mxu0 %v3880_v14  ;;  %v493_v14 = vrot.slane %v389_v51, 1  ;;  %v494_v11 = vrot.slane %v390_v8, 1 }
 0x140   : > { %2205 = vst [vmem:[%s3921_s12 + $0x1c0] sm:$0xff] %v1917_v34 }
 0x141   : > { %v4143_v48 = vpop.f32.mrb[30].mxu1  ;;  %v719_v2 = vpop.f32.mrb[30].mxu0 }
 0x142   : > { %v4145_v58 = vpop.f32.mrb[31].mxu1  ;;  %1631 = vmatmul.mubr.f32.gmra.mrb[136].mxu1 %v2885_v17  ;;  %2667 = vmatmul.mubr.msk.f32.gmra.mrb[136].mxu0 %vm395_vm1, %v3888_v32  ;;  %v1918_v0 = vadd.f32 %v3908_v57, %v719_v2  ;;  %v4152_v1 = vpop.f32.mrb[31].mxu0 }
 0x143   : > { %1636 = vmatprep.mubr.f32.mxu1 %v2912_v7  ;;  %2669 = vmatprep.mubr.f32.mxu0 %v3900_v50  ;;  %v495_v50 = vsel %vm428_vm0, %v493_v14, %v494_v11 }
 0x144   : > { %2206 = vst [vmem:[%s3921_s12 + $0x1d0] sm:$0xff] %v1918_v0 }
 0x145   : > { %v4157_v25 = vpop.f32.mrb[32].mxu1  ;;  %v725_v9 = vpop.f32.mrb[32].mxu0 }
 0x146   : > { %v4159_v28 = vpop.f32.mrb[33].mxu1  ;;  %1637 = vmatmul.mubr.f32.gmra.mrb[138].mxu1 %v2886_v38  ;;  %2670 = vmatmul.mubr.msk.f32.gmra.mrb[138].mxu0 %vm395_vm1, %v3914_v4  ;;  %v1919_v32 = vadd.f32 %v3908_v57, %v725_v9  ;;  %v4166_v24 = vpop.f32.mrb[33].mxu0 }
 0x147   : > { %1642 = vmatprep.mubr.f32.mxu1 %v2912_v7  ;;  %2672 = vmatprep.mubr.f32.mxu0 %v3937_v54  ;;  %v496_v54 = vsel %vm428_vm0, %v494_v11, %v493_v14 }
 0x148   : > { %2207 = vst [vmem:[%s3921_s12 + $0x200] sm:$0xff] %v1919_v32 }
 0x149   : > { %v4173_v41 = vpop.f32.mrb[34].mxu1  ;;  %v731_v23 = vpop.f32.mrb[34].mxu0 }
 0x14a   : > { %4782 = vst [vmem:[#allocation8_spill] sm:$0xff] %v4173_v41  ;;  %v4175_v34 = vpop.f32.mrb[35].mxu1  ;;  %1643 = vmatmul.mubr.f32.gmra.mrb[140].mxu1 %v389_v51  ;;  %2673 = vmatmul.mubr.msk.f32.gmra.mrb[140].mxu0 %vm395_vm1, %v3953_v10  ;;  %v1920_v4 = vadd.f32 %v3908_v57, %v731_v23  ;;  %v4181_v2 = vpop.f32.mrb[35].mxu0 }
 0x14b   : > { %1648 = vmatprep.mubr.f32.mxu1 %v2912_v7  ;;  %2675 = vmatprep.mubr.f32.mxu0 %v495_v50 }
 0x14c   : > { %2208 = vst [vmem:[%s3921_s12 + $0x210] sm:$0xff] %v1920_v4 }
 0x14d   : > { %v4187_v17 = vpop.f32.mrb[36].mxu1  ;;  %v737_v0 = vpop.f32.mrb[36].mxu0 }
 0x14e   : > { %4783 = vst [vmem:[#allocation9_spill] sm:$0xff] %v4187_v17  ;;  %v4189_v51 = vpop.f32.mrb[37].mxu1  ;;  %1649 = vmatmul.mubr.f32.gmra.mrb[142].mxu1 %v390_v8  ;;  %2676 = vmatmul.mubr.msk.f32.gmra.mrb[142].mxu0 %vm395_vm1, %v496_v54  ;;  %v1921_v10 = vadd.f32 %v3908_v57, %v737_v0  ;;  %v4194_v9 = vpop.f32.mrb[37].mxu0 }
 0x150   : > { %2209 = vst [vmem:[%s3921_s12 + $0x240] sm:$0xff] %v1921_v10 }
 0x151   : > { %v4197_v7 = vpop.f32.mrb[38].mxu1  ;;  %v743_v27 = vpop.f32.mrb[38].mxu0 }
 0x152   : > { %4784 = vst [vmem:[#allocation10_spill] sm:$0xff] %v4197_v7  ;;  %v4199_v14 = vpop.f32.mrb[39].mxu1  ;;  %v1922_v11 = vadd.f32 %v3908_v57, %v743_v27  ;;  %v4202_v38 = vpop.f32.mrb[39].mxu0 }
 0x154   : > { %2210 = vst [vmem:[%s3921_s12 + $0x250] sm:$0xff] %v1922_v11 }
 0x155   : > { %v4205_v8 = vpop.f32.mrb[40].mxu1  ;;  %v749_v26 = vpop.f32.mrb[40].mxu0 }
 0x156   : > { %4785 = vst [vmem:[#allocation11_spill] sm:$0xff] %v4205_v8  ;;  %v4207_v32 = vpop.f32.mrb[41].mxu1  ;;  %v1923_v50 = vadd.f32 %v3908_v57, %v749_v26  ;;  %v4210_v23 = vpop.f32.mrb[41].mxu0 }
 0x158   : > { %2211 = vst [vmem:[%s3921_s12 + $0x280] sm:$0xff] %v1923_v50 }
 0x159   : > { %v4213_v4 = vpop.f32.mrb[42].mxu1  ;;  %v755_v54 = vpop.f32.mrb[42].mxu0 }
 0x15a   : > { %4786 = vst [vmem:[#allocation12_spill] sm:$0xff] %v4213_v4  ;;  %v4215_v0 = vpop.f32.mrb[43].mxu1  ;;  %v1924_v10 = vadd.f32 %v3908_v57, %v755_v54  ;;  %v4218_v27 = vpop.f32.mrb[43].mxu0 }
 0x15c   : > { %2212 = vst [vmem:[%s3921_s12 + $0x290] sm:$0xff] %v1924_v10 }
 0x15d   : > { %v4221_v11 = vpop.f32.mrb[44].mxu1  ;;  %v761_v13 = vpop.f32.mrb[44].mxu0 }
 0x15e   : > { %4787 = vst [vmem:[#allocation13_spill] sm:$0xff] %v4221_v11  ;;  %v4223_v6 = vpop.f32.mrb[45].mxu1  ;;  %v1925_v26 = vadd.f32 %v3908_v57, %v761_v13  ;;  %v4226_v61 = vpop.f32.mrb[45].mxu0 }
 0x160   : > { %2213 = vst [vmem:[%s3921_s12 + $0x2c0] sm:$0xff] %v1925_v26 }
 0x161   : > { %v4229_v50 = vpop.f32.mrb[46].mxu1  ;;  %v767_v4 = vpop.f32.mrb[46].mxu0 }
 0x162   : > { %4788 = vst [vmem:[#allocation14_spill] sm:$0xff] %v4229_v50  ;;  %v4231_v8 = vpop.f32.mrb[47].mxu1  ;;  %v1926_v54 = vadd.f32 %v3908_v57, %v767_v4  ;;  %v4234_v47 = vpop.f32.mrb[47].mxu0 }
 0x164   : > { %2214 = vst [vmem:[%s3921_s12 + $0x2d0] sm:$0xff] %v1926_v54 }
 0x165   : > { %v4237_v10 = vpop.f32.mrb[48].mxu1  ;;  %v1175_v11 = vpop.f32.mrb[48].mxu0 }
 0x166   : > { %4789 = vst [vmem:[#allocation15_spill] sm:$0xff] %v4237_v10  ;;  %v1935_v13 = vadd.f32 %v1175_v11, %v3931_v33  ;;  %v4240_v7 = vpop.f32.mrb[49].mxu1  ;;  %v1177_v26 = vpop.f32.mrb[49].mxu0 }
 0x167   : > { %v4243_v59 = vadd.f32 %v1177_v26, %v4043_v22 }
 0x168   : > { %v1967_v50 = vadd.f32 %v3908_v57, %v1935_v13 }
 0x169   : > { %v4246_v17 = vpop.f32.mrb[50].mxu1  ;;  %v1181_v4 = vpop.f32.mrb[50].mxu0 }
 0x16a   : > { %4790 = vst [vmem:[#allocation16_spill] sm:$0xff] %v4246_v17  ;;  %2223 = vst [vmem:[%s3921_s12 + $0x8] sm:$0xff] %v1967_v50  ;;  %v1936_v54 = vadd.f32 %v1181_v4, %v3947_v45  ;;  %v4250_v10 = vpop.f32.mrb[51].mxu1  ;;  %v1183_v30 = vpop.f32.mrb[51].mxu0 }
 0x16b   : > { %v4253_v33 = vadd.f32 %v1183_v30, %v4057_v36 }
 0x16c   : > { %v1968_v11 = vadd.f32 %v3908_v57, %v1936_v54 }
 0x16d   : > { %v4256_v41 = vpop.f32.mrb[52].mxu1  ;;  %v1187_v22 = vpop.f32.mrb[52].mxu0 }
 0x16e   : > { %4791 = vst [vmem:[#allocation17_spill] sm:$0xff] %v4256_v41  ;;  %2224 = vst [vmem:[%s3921_s12 + $0x18] sm:$0xff] %v1968_v11  ;;  %v1937_v13 = vadd.f32 %v1187_v22, %v3965_v19  ;;  %v4260_v26 = vpop.f32.mrb[53].mxu1  ;;  %v1189_v50 = vpop.f32.mrb[53].mxu0 }
 0x16f   : > { %v4263_v45 = vadd.f32 %v1189_v50, %v4071_v15 }
 0x170   : > { %v1969_v4 = vadd.f32 %v3908_v57, %v1937_v13 }
 0x171   : > { %v4266_v17 = vpop.f32.mrb[54].mxu1  ;;  %v1193_v30 = vpop.f32.mrb[54].mxu0 }
 0x172   : > { %4792 = vst [vmem:[#allocation18_spill] sm:$0xff] %v4266_v17  ;;  %2225 = vst [vmem:[%s3921_s12 + $0x48] sm:$0xff] %v1969_v4  ;;  %v1938_v36 = vadd.f32 %v1193_v30, %v3979_v42  ;;  %v4270_v54 = vpop.f32.mrb[55].mxu1  ;;  %v1195_v11 = vpop.f32.mrb[55].mxu0 }
 0x173   : > { %v4273_v19 = vadd.f32 %v1195_v11, %v4085_v18 }
 0x174   : > { %v1970_v22 = vadd.f32 %v3908_v57, %v1938_v36 }
 0x175   : > { %v4276_v41 = vpop.f32.mrb[56].mxu1  ;;  %v1199_v15 = vpop.f32.mrb[56].mxu0 }
 0x176   : > { %4793 = vst [vmem:[#allocation19_spill] sm:$0xff] %v4276_v41  ;;  %2226 = vst [vmem:[%s3921_s12 + $0x58] sm:$0xff] %v1970_v22  ;;  %v1939_v13 = vadd.f32 %v1199_v15, %v3993_v43  ;;  %v4280_v50 = vpop.f32.mrb[57].mxu1  ;;  %v1201_v4 = vpop.f32.mrb[57].mxu0 }
 0x177   : > { %v4283_v42 = vadd.f32 %v1201_v4, %v4099_v20 }
 0x178   : > { %v1971_v30 = vadd.f32 %v3908_v57, %v1939_v13 }
 0x179   : > { %v4286_v17 = vpop.f32.mrb[58].mxu1  ;;  %v1205_v18 = vpop.f32.mrb[58].mxu0 }
 0x17a   : > { %4794 = vst [vmem:[#allocation20_spill] sm:$0xff] %v4286_v17  ;;  %2227 = vst [vmem:[%s3921_s12 + $0x88] sm:$0xff] %v1971_v30  ;;  %v1940_v36 = vadd.f32 %v1205_v18, %v4007_v29  ;;  %v4290_v11 = vpop.f32.mrb[59].mxu1  ;;  %v1207_v22 = vpop.f32.mrb[59].mxu0 }
 0x17b   : > { %v4293_v43 = vadd.f32 %v1207_v22, %v4113_v21 }
 0x17c   : > { %v1972_v15 = vadd.f32 %v3908_v57, %v1940_v36 }
 0x17d   : > { %v4296_v41 = vpop.f32.mrb[60].mxu1  ;;  %v1211_v20 = vpop.f32.mrb[60].mxu0 }
 0x17e   : > { %4795 = vst [vmem:[#allocation21_spill] sm:$0xff] %v4296_v41  ;;  %2228 = vst [vmem:[%s3921_s12 + $0x98] sm:$0xff] %v1972_v15  ;;  %v1941_v13 = vadd.f32 %v1211_v20, %v4021_v3  ;;  %v4300_v4 = vpop.f32.mrb[61].mxu1  ;;  %v1213_v30 = vpop.f32.mrb[61].mxu0 }
 0x17f   : > { %v4303_v29 = vadd.f32 %v1213_v30, %v4128_v35 }
 0x180   : > { %v1973_v18 = vadd.f32 %v3908_v57, %v1941_v13 }
 0x181   : > { %v4306_v17 = vpop.f32.mrb[62].mxu1  ;;  %v1217_v21 = vpop.f32.mrb[62].mxu0 }
 0x182   : > { %4796 = vst [vmem:[#allocation22_spill] sm:$0xff] %v4306_v17  ;;  %2229 = vst [vmem:[%s3921_s12 + $0xc8] sm:$0xff] %v1973_v18  ;;  %v1942_v36 = vadd.f32 %v1217_v21, %v4035_v39  ;;  %v4310_v22 = vpop.f32.mrb[63].mxu1  ;;  %v1219_v15 = vpop.f32.mrb[63].mxu0 }
 0x183   : > { %v4313_v3 = vadd.f32 %v1219_v15, %v4145_v58 }
 0x184   : > { %v1974_v20 = vadd.f32 %v3908_v57, %v1942_v36 }
 0x185   : > { %v4316_v41 = vpop.f32.mrb[64].mxu1  ;;  %v1223_v35 = vpop.f32.mrb[64].mxu0 }
 0x186   : > { %4797 = vst [vmem:[#allocation23_spill] sm:$0xff] %v4316_v41  ;;  %2230 = vst [vmem:[%s3921_s12 + $0xd8] sm:$0xff] %v1974_v20  ;;  %v1943_v13 = vadd.f32 %v1223_v35, %v4050_v46  ;;  %v4320_v30 = vpop.f32.mrb[65].mxu1  ;;  %v1225_v18 = vpop.f32.mrb[65].mxu0 }
 0x187   : > { %v4323_v39 = vadd.f32 %v1225_v18, %v4159_v28 }
 0x188   : > { %v1975_v21 = vadd.f32 %v3908_v57, %v1943_v13 }
 0x189   : > { %v4326_v17 = vpop.f32.mrb[66].mxu1  ;;  %v1229_v58 = vpop.f32.mrb[66].mxu0 }
 0x18a   : > { %4798 = vst [vmem:[#allocation24_spill] sm:$0xff] %v4326_v17  ;;  %2231 = vst [vmem:[%s3921_s12 + $0x108] sm:$0xff] %v1975_v21  ;;  %v1944_v36 = vadd.f32 %v1229_v58, %v4064_v44  ;;  %v4330_v15 = vpop.f32.mrb[67].mxu1  ;;  %v1231_v20 = vpop.f32.mrb[67].mxu0 }
 0x18b   : > { %v4333_v46 = vadd.f32 %v1231_v20, %v4175_v34 }
 0x18c   : > { %v1976_v35 = vadd.f32 %v3908_v57, %v1944_v36 }
 0x18d   : > { %v4336_v41 = vpop.f32.mrb[68].mxu1  ;;  %v1235_v28 = vpop.f32.mrb[68].mxu0 }
 0x18e   : > { %4799 = vst [vmem:[#allocation25_spill] sm:$0xff] %v4336_v41  ;;  %2232 = vst [vmem:[%s3921_s12 + $0x118] sm:$0xff] %v1976_v35  ;;  %v1945_v13 = vadd.f32 %v1235_v28, %v4078_v60  ;;  %v4340_v18 = vpop.f32.mrb[69].mxu1  ;;  %v1237_v21 = vpop.f32.mrb[69].mxu0 }
 0x18f   : > { %v4343_v44 = vadd.f32 %v1237_v21, %v4189_v51 }
 0x190   : > { %v1977_v58 = vadd.f32 %v3908_v57, %v1945_v13 }
 0x191   : > { %v4346_v17 = vpop.f32.mrb[70].mxu1  ;;  %v1241_v34 = vpop.f32.mrb[70].mxu0 }
 0x192   : > { %4800 = vst [vmem:[#allocation26_spill] sm:$0xff] %v4346_v17  ;;  %2233 = vst [vmem:[%s3921_s12 + $0x148] sm:$0xff] %v1977_v58  ;;  %v1946_v36 = vadd.f32 %v1241_v34, %v4092_v12  ;;  %v4350_v20 = vpop.f32.mrb[71].mxu1  ;;  %v1243_v35 = vpop.f32.mrb[71].mxu0 }
 0x193   : > { %v4353_v60 = vadd.f32 %v1243_v35, %v4199_v14 }
 0x194   : > { %v1978_v28 = vadd.f32 %v3908_v57, %v1946_v36 }
 0x195   : > { %v4356_v41 = vpop.f32.mrb[72].mxu1  ;;  %v1247_v51 = vpop.f32.mrb[72].mxu0 }
 0x196   : > { %4801 = vst [vmem:[#allocation27_spill] sm:$0xff] %v4356_v41  ;;  %2234 = vst [vmem:[%s3921_s12 + $0x158] sm:$0xff] %v1978_v28  ;;  %v1947_v13 = vadd.f32 %v1247_v51, %v4106_v37  ;;  %v4360_v21 = vpop.f32.mrb[73].mxu1  ;;  %v1249_v58 = vpop.f32.mrb[73].mxu0 }
 0x197   : > { %v4363_v12 = vadd.f32 %v1249_v58, %v4207_v32 }
 0x198   : > { %v1979_v34 = vadd.f32 %v3908_v57, %v1947_v13 }
 0x199   : > { %v4366_v17 = vpop.f32.mrb[74].mxu1  ;;  %v1253_v14 = vpop.f32.mrb[74].mxu0 }
 0x19a   : > { %4802 = vst [vmem:[#allocation28_spill] sm:$0xff] %v4366_v17  ;;  %2235 = vst [vmem:[%s3921_s12 + $0x188] sm:$0xff] %v1979_v34  ;;  %v1948_v36 = vadd.f32 %v1253_v14, %v4120_v62  ;;  %v4370_v35 = vpop.f32.mrb[75].mxu1  ;;  %v1255_v28 = vpop.f32.mrb[75].mxu0 }
 0x19b   : > { %v4373_v37 = vadd.f32 %v1255_v28, %v4215_v0 }
 0x19c   : > { %v1980_v51 = vadd.f32 %v3908_v57, %v1948_v36 }
 0x19d   : > { %v4376_v41 = vpop.f32.mrb[76].mxu1  ;;  %v1259_v32 = vpop.f32.mrb[76].mxu0 }
 0x19e   : > { %4803 = vst [vmem:[#allocation29_spill] sm:$0xff] %v4376_v41  ;;  %2236 = vst [vmem:[%s3921_s12 + $0x198] sm:$0xff] %v1980_v51  ;;  %v1949_v13 = vadd.f32 %v1259_v32, %v4135_v52  ;;  %v4380_v58 = vpop.f32.mrb[77].mxu1  ;;  %v1261_v34 = vpop.f32.mrb[77].mxu0 }
 0x19f   : > { %v4383_v62 = vadd.f32 %v1261_v34, %v4223_v6 }
 0x1a0   : > { %v1981_v14 = vadd.f32 %v3908_v57, %v1949_v13 }
 0x1a1   : > { %v4386_v17 = vpop.f32.mrb[78].mxu1  ;;  %v1265_v0 = vpop.f32.mrb[78].mxu0 }
 0x1a2   : > { %4804 = vst [vmem:[#allocation30_spill] sm:$0xff] %v4386_v17  ;;  %2237 = vst [vmem:[%s3921_s12 + $0x1c8] sm:$0xff] %v1981_v14  ;;  %v1950_v36 = vadd.f32 %v1265_v0, %v4152_v1  ;;  %v4390_v28 = vpop.f32.mrb[79].mxu1  ;;  %v1267_v51 = vpop.f32.mrb[79].mxu0 }
 0x1a3   : > { %v4393_v52 = vadd.f32 %v1267_v51, %v4231_v8 }
 0x1a4   : > { %v1982_v32 = vadd.f32 %v3908_v57, %v1950_v36 }
 0x1a5   : > { %v1271_v6 = vpop.f32.mrb[80].mxu0  ;;  %v1464_v34 = vpop.f32.mrb[80].mxu1 }
 0x1a6   : > { %2238 = vst [vmem:[%s3921_s12 + $0x1d8] sm:$0xff] %v1982_v32  ;;  %v1951_v13 = vadd.f32 %v1271_v6, %v4166_v24  ;;  %v1999_v17 = vadd.f32 %v1464_v34, %v4041_v40  ;;  %v1273_v14 = vpop.f32.mrb[81].mxu0  ;;  %v1466_v41 = vpop.f32.mrb[81].mxu1 }
 0x1a7   : > { %v4400_v1 = vadd.f32 %v1273_v14, %v4240_v7  ;;  %v4403_v0 = vadd.f32 %v4243_v59, %v1466_v41 }
 0x1a8   : > { %v1983_v8 = vadd.f32 %v3908_v57, %v1951_v13  ;;  %v2031_v36 = vadd.f32 %v3908_v57, %v1999_v17 }
 0x1a9   : > { %v1277_v51 = vpop.f32.mrb[82].mxu0  ;;  %v1470_v32 = vpop.f32.mrb[82].mxu1 }
 0x1aa   : > { %2239 = vst [vmem:[%s3921_s12 + $0x208] sm:$0xff] %v1983_v8  ;;  %2481 = vst [vmem:[%s3921_s12 + $0x20] sm:$0xff] %v2031_v36  ;;  %v1952_v40 = vadd.f32 %v1277_v51, %v4181_v2  ;;  %v2000_v24 = vadd.f32 %v1470_v32, %v4055_v49  ;;  %v1279_v6 = vpop.f32.mrb[83].mxu0  ;;  %v1472_v7 = vpop.f32.mrb[83].mxu1 }
 0x1ab   : > { %v4412_v34 = vadd.f32 %v1279_v6, %v4250_v10  ;;  %v4415_v59 = vadd.f32 %v4253_v33, %v1472_v7 }
 0x1ac   : > { %v1984_v41 = vadd.f32 %v3908_v57, %v1952_v40  ;;  %v2032_v17 = vadd.f32 %v3908_v57, %v2000_v24 }
 0x1ad   : > { %v1283_v13 = vpop.f32.mrb[84].mxu0  ;;  %v1476_v14 = vpop.f32.mrb[84].mxu1 }
 0x1ae   : > { %2240 = vst [vmem:[%s3921_s12 + $0x218] sm:$0xff] %v1984_v41  ;;  %2482 = vst [vmem:[%s3921_s12 + $0x30] sm:$0xff] %v2032_v17  ;;  %v1953_v49 = vadd.f32 %v1283_v13, %v4194_v9  ;;  %v2001_v2 = vadd.f32 %v1476_v14, %v4069_v55  ;;  %v1285_v8 = vpop.f32.mrb[85].mxu0  ;;  %v1478_v10 = vpop.f32.mrb[85].mxu1 }
 0x1af   : > { %v4424_v36 = vadd.f32 %v1285_v8, %v4260_v26  ;;  %v4427_v33 = vadd.f32 %v4263_v45, %v1478_v10 }
 0x1b0   : > { %v1985_v51 = vadd.f32 %v3908_v57, %v1953_v49  ;;  %v2033_v32 = vadd.f32 %v3908_v57, %v2001_v2 }
 0x1b1   : > { %v1289_v40 = vpop.f32.mrb[86].mxu0  ;;  %v1482_v24 = vpop.f32.mrb[86].mxu1 }
 0x1b2   : > { %2241 = vst [vmem:[%s3921_s12 + $0x248] sm:$0xff] %v1985_v51  ;;  %2483 = vst [vmem:[%s3921_s12 + $0x60] sm:$0xff] %v2033_v32  ;;  %v1954_v55 = vadd.f32 %v1289_v40, %v4202_v38  ;;  %v2002_v9 = vadd.f32 %v1482_v24, %v4083_v63  ;;  %v1291_v6 = vpop.f32.mrb[87].mxu0  ;;  %v1484_v26 = vpop.f32.mrb[87].mxu1 }
 0x1b3   : > { %v4436_v7 = vadd.f32 %v1291_v6, %v4270_v54  ;;  %v4439_v45 = vadd.f32 %v4273_v19, %v1484_v26 }
 0x1b4   : > { %v1986_v41 = vadd.f32 %v3908_v57, %v1954_v55  ;;  %v2034_v17 = vadd.f32 %v3908_v57, %v2002_v9 }
 0x1b5   : > { %v1295_v13 = vpop.f32.mrb[88].mxu0  ;;  %v1488_v14 = vpop.f32.mrb[88].mxu1 }
 0x1b6   : > { %2242 = vst [vmem:[%s3921_s12 + $0x258] sm:$0xff] %v1986_v41  ;;  %2484 = vst [vmem:[%s3921_s12 + $0x70] sm:$0xff] %v2034_v17  ;;  %v1955_v63 = vadd.f32 %v1295_v13, %v4210_v23  ;;  %v2003_v38 = vadd.f32 %v1488_v14, %v4097_v31  ;;  %v1297_v49 = vpop.f32.mrb[89].mxu0  ;;  %v1490_v54 = vpop.f32.mrb[89].mxu1 }
 0x1b7   : > { %v4448_v2 = vadd.f32 %v1297_v49, %v4280_v50  ;;  %v4451_v19 = vadd.f32 %v4283_v42, %v1490_v54 }
 0x1b8   : > { %v1987_v8 = vadd.f32 %v3908_v57, %v1955_v63  ;;  %v2035_v10 = vadd.f32 %v3908_v57, %v2003_v38 }
 0x1b9   : > { %v1301_v51 = vpop.f32.mrb[90].mxu0  ;;  %v1494_v32 = vpop.f32.mrb[90].mxu1 }
 0x1ba   : > { %2243 = vst [vmem:[%s3921_s12 + $0x288] sm:$0xff] %v1987_v8  ;;  %2485 = vst [vmem:[%s3921_s12 + $0xa0] sm:$0xff] %v2035_v10  ;;  %v1956_v31 = vadd.f32 %v1301_v51, %v4218_v27  ;;  %v2004_v23 = vadd.f32 %v1494_v32, %v4111_v56  ;;  %v1303_v40 = vpop.f32.mrb[91].mxu0  ;;  %v1496_v50 = vpop.f32.mrb[91].mxu1 }
 0x1bb   : > { %v4460_v24 = vadd.f32 %v1303_v40, %v4290_v11  ;;  %v4463_v42 = vadd.f32 %v4293_v43, %v1496_v50 }
 0x1bc   : > { %v1988_v55 = vadd.f32 %v3908_v57, %v1956_v31  ;;  %v2036_v9 = vadd.f32 %v3908_v57, %v2004_v23 }
 0x1bd   : > { %v1307_v6 = vpop.f32.mrb[92].mxu0  ;;  %v1500_v26 = vpop.f32.mrb[92].mxu1 }
 0x1be   : > { %2244 = vst [vmem:[%s3921_s12 + $0x298] sm:$0xff] %v1988_v55  ;;  %2486 = vst [vmem:[%s3921_s12 + $0xb0] sm:$0xff] %v2036_v9  ;;  %v1957_v56 = vadd.f32 %v1307_v6, %v4226_v61  ;;  %v2005_v27 = vadd.f32 %v1500_v26, %v4126_v16  ;;  %v1309_v41 = vpop.f32.mrb[93].mxu0  ;;  %v1502_v11 = vpop.f32.mrb[93].mxu1 }
 0x1bf   : > { %v4472_v17 = vadd.f32 %v1309_v41, %v4300_v4  ;;  %v4475_v43 = vadd.f32 %v4303_v29, %v1502_v11 }
 0x1c0   : > { %v1989_v13 = vadd.f32 %v3908_v57, %v1957_v56  ;;  %v2037_v14 = vadd.f32 %v3908_v57, %v2005_v27 }
 0x1c1   : > { %v1313_v63 = vpop.f32.mrb[94].mxu0  ;;  %v1506_v38 = vpop.f32.mrb[94].mxu1 }
 0x1c2   : > { %2245 = vst [vmem:[%s3921_s12 + $0x2c8] sm:$0xff] %v1989_v13  ;;  %2487 = vst [vmem:[%s3921_s12 + $0xe0] sm:$0xff] %v2037_v14  ;;  %v1958_v61 = vadd.f32 %v1313_v63, %v4234_v47  ;;  %v2006_v16 = vadd.f32 %v1506_v38, %v4143_v48  ;;  %v1315_v49 = vpop.f32.mrb[95].mxu0  ;;  %v1508_v4 = vpop.f32.mrb[95].mxu1  ;;  %v4807_v63 = vld [vmem:[#allocation9_spill] sm:$0xff] }
 0x1c3   : > { %v4484_v54 = vadd.f32 %v1315_v49, %v4310_v22  ;;  %v4487_v29 = vadd.f32 %v4313_v3, %v1508_v4 }
 0x1c4   : > { %v1990_v8 = vadd.f32 %v3908_v57, %v1958_v61  ;;  %v2038_v10 = vadd.f32 %v3908_v57, %v2006_v16 }
 0x1c5   : > { %v1319_v51 = vpop.f32.mrb[96].mxu0  ;;  %v1512_v32 = vpop.f32.mrb[96].mxu1 }
 0x1c6   : > { %2246 = vst [vmem:[%s3921_s12 + $0x2d8] sm:$0xff] %v1990_v8  ;;  %2488 = vst [vmem:[%s3921_s12 + $0xf0] sm:$0xff] %v2038_v10  ;;  %v1959_v47 = vadd.f32 %v1319_v51, %v3924_v53  ;;  %v2007_v48 = vadd.f32 %v1512_v32, %v4157_v25  ;;  %v1321_v31 = vpop.f32.mrb[97].mxu0  ;;  %v1514_v22 = vpop.f32.mrb[97].mxu1  ;;  %v4805_v25 = vld [vmem:[#allocation8_spill] sm:$0xff]  ;;  %v4808_v51 = vld [vmem:[#allocation3_spill] sm:$0xff] }
 0x1c7   : > { %v4496_v23 = vadd.f32 %v1321_v31, %v4320_v30  ;;  %v4499_v3 = vadd.f32 %v4323_v39, %v1514_v22 }
 0x1c8   : > { %v1991_v40 = vadd.f32 %v3908_v57, %v1959_v47  ;;  %v2039_v50 = vadd.f32 %v3908_v57, %v2007_v48  ;;  %v4809_v47 = vld [vmem:[#allocation10_spill] sm:$0xff] }
 0x1c9   : > { %v1325_v55 = vpop.f32.mrb[98].mxu0  ;;  %v1518_v9 = vpop.f32.mrb[98].mxu1 }
 0x1ca   : > { %2247 = vst [vmem:[%s3921_s12 + $0x308] sm:$0xff] %v1991_v40  ;;  %2489 = vst [vmem:[%s3921_s12 + $0x120] sm:$0xff] %v2039_v50  ;;  %v1960_v53 = vadd.f32 %v1325_v55, %v3942_v5  ;;  %v2008_v6 = vadd.f32 %v1518_v9, %v4805_v25  ;;  %v1327_v26 = vpop.f32.mrb[99].mxu0  ;;  %v1520_v30 = vpop.f32.mrb[99].mxu1  ;;  %v4806_v5 = vld [vmem:[#allocation2_spill] sm:$0xff]  ;;  %v4811_v25 = vld [vmem:[#allocation11_spill] sm:$0xff] }
 0x1cb   : > { %v4508_v56 = vadd.f32 %v1327_v26, %v4330_v15  ;;  %v4511_v39 = vadd.f32 %v4333_v46, %v1520_v30 }
 0x1cc   : > { %v1992_v27 = vadd.f32 %v3908_v57, %v1960_v53  ;;  %v2040_v41 = vadd.f32 %v3908_v57, %v2008_v6 }
 0x1cd   : > { %v1331_v11 = vpop.f32.mrb[100].mxu0  ;;  %v1524_v13 = vpop.f32.mrb[100].mxu1 }
 0x1ce   : > { %2248 = vst [vmem:[%s3921_s12 + $0x318] sm:$0xff] %v1992_v27  ;;  %2490 = vst [vmem:[%s3921_s12 + $0x130] sm:$0xff] %v2040_v41  ;;  %v1961_v14 = vadd.f32 %v1331_v11, %v4806_v5  ;;  %v2009_v38 = vadd.f32 %v1524_v13, %v4807_v63  ;;  %v1333_v61 = vpop.f32.mrb[101].mxu0  ;;  %v1526_v15 = vpop.f32.mrb[101].mxu1 }
 0x1cf   : > { %v4520_v16 = vadd.f32 %v1333_v61, %v4340_v18  ;;  %v4523_v46 = vadd.f32 %v4343_v44, %v1526_v15 }
 0x1d0   : > { %v1993_v49 = vadd.f32 %v3908_v57, %v1961_v14  ;;  %v2041_v4 = vadd.f32 %v3908_v57, %v2009_v38  ;;  %v4540_v57 = vld [vmem:[%s4774_s6] ss:$0 sm:$0xff]  ;;  %v4812_v14 = vld [vmem:[#allocation5_spill] sm:$0xff]  ;;  %v4813_v38 = vld [vmem:[#allocation12_spill] sm:$0xff] }
 0x1d1   : > { %v1337_v8 = vpop.f32.mrb[102].mxu0  ;;  %v1530_v10 = vpop.f32.mrb[102].mxu1 }
 0x1d2   : > { %2249 = vst [vmem:[%s3921_s12 + $0x348] sm:$0xff] %v1993_v49  ;;  %2491 = vst [vmem:[%s3921_s12 + $0x160] sm:$0xff] %v2041_v4  ;;  %v1962_v32 = vadd.f32 %v1337_v8, %v4808_v51  ;;  %v2010_v48 = vadd.f32 %v1530_v10, %v4809_v47  ;;  %v1339_v31 = vpop.f32.mrb[103].mxu0  ;;  %v1532_v18 = vpop.f32.mrb[103].mxu1 }
 0x1d3   : > { %v4532_v22 = vadd.f32 %v1339_v31, %v4350_v20  ;;  %v4535_v44 = vadd.f32 %v4353_v60, %v1532_v18  ;;  %v4810_v20 = vld [vmem:[#allocation4_spill] sm:$0xff] }
 0x1d4   : > { %v1994_v40 = vadd.f32 %v4540_v57, %v1962_v32  ;;  %v2042_v50 = vadd.f32 %v4540_v57, %v2010_v48  ;;  %v4814_v32 = vld [vmem:[#allocation6_spill] sm:$0xff]  ;;  %v4815_v48 = vld [vmem:[#allocation13_spill] sm:$0xff] }
 0x1d5   : > { %v1343_v55 = vpop.f32.mrb[104].mxu0  ;;  %v1536_v9 = vpop.f32.mrb[104].mxu1 }
 0x1d6   : > { %2250 = vst [vmem:[%s3921_s12 + $0x358] sm:$0xff] %v1994_v40  ;;  %2492 = vst [vmem:[%s3921_s12 + $0x170] sm:$0xff] %v2042_v50  ;;  %v1963_v53 = vadd.f32 %v1343_v55, %v4810_v20  ;;  %v2011_v60 = vadd.f32 %v1536_v9, %v4811_v25  ;;  %v1345_v6 = vpop.f32.mrb[105].mxu0  ;;  %v1538_v26 = vpop.f32.mrb[105].mxu1 }
 0x1d7   : > { %v4549_v30 = vadd.f32 %v1345_v6, %v4360_v21  ;;  %v4552_v27 = vadd.f32 %v4363_v12, %v1538_v26 }
 0x1d8   : > { %v1995_v41 = vadd.f32 %v4540_v57, %v1963_v53  ;;  %v2043_v11 = vadd.f32 %v4540_v57, %v2011_v60  ;;  %v4816_v53 = vld [vmem:[#allocation7_spill] sm:$0xff]  ;;  %v4817_v60 = vld [vmem:[#allocation14_spill] sm:$0xff] }
 0x1d9   : > { %v1349_v13 = vpop.f32.mrb[106].mxu0  ;;  %v1542_v5 = vpop.f32.mrb[106].mxu1 }
 0x1da   : > { %2251 = vst [vmem:[%s3921_s12 + $0x388] sm:$0xff] %v1995_v41  ;;  %2493 = vst [vmem:[%s3921_s12 + $0x1a0] sm:$0xff] %v2043_v11  ;;  %v1964_v63 = vadd.f32 %v1349_v13, %v4812_v14  ;;  %v2012_v61 = vadd.f32 %v1542_v5, %v4813_v38  ;;  %v1351_v15 = vpop.f32.mrb[107].mxu0  ;;  %v1544_v21 = vpop.f32.mrb[107].mxu1 }
 0x1db   : > { %v4561_v49 = vadd.f32 %v1351_v15, %v4370_v35  ;;  %v4564_v12 = vadd.f32 %v4373_v37, %v1544_v21 }
 0x1dc   : > { %v1996_v4 = vadd.f32 %v4540_v57, %v1964_v63  ;;  %v2044_v8 = vadd.f32 %v4540_v57, %v2012_v61  ;;  %v4818_v63 = vld [vmem:[#allocation15_spill] sm:$0xff] }
 0x1dd   : > { %v1355_v10 = vpop.f32.mrb[108].mxu0  ;;  %v1548_v51 = vpop.f32.mrb[108].mxu1 }
 0x1de   : > { %2252 = vst [vmem:[%s3921_s12 + $0x398] sm:$0xff] %v1996_v4  ;;  %2494 = vst [vmem:[%s3921_s12 + $0x1b0] sm:$0xff] %v2044_v8  ;;  %v1965_v47 = vadd.f32 %v1355_v10, %v4814_v32  ;;  %v2013_v31 = vadd.f32 %v1548_v51, %v4815_v48  ;;  %v1357_v18 = vpop.f32.mrb[109].mxu0  ;;  %v1550_v35 = vpop.f32.mrb[109].mxu1 }
 0x1df   : > { %v4573_v40 = vadd.f32 %v1357_v18, %v4380_v58  ;;  %v4576_v37 = vadd.f32 %v4383_v62, %v1550_v35 }
 0x1e0   : > { %v1997_v50 = vadd.f32 %v4540_v57, %v1965_v47  ;;  %v2045_v55 = vadd.f32 %v4540_v57, %v2013_v31 }
 0x1e1   : > { %v1361_v9 = vpop.f32.mrb[110].mxu0  ;;  %v1554_v20 = vpop.f32.mrb[110].mxu1 }
 0x1e2   : > { %2253 = vst [vmem:[%s3921_s12 + $0x3c8] sm:$0xff] %v1997_v50  ;;  %2495 = vst [vmem:[%s3921_s12 + $0x1e0] sm:$0xff] %v2045_v55  ;;  %v1966_v25 = vadd.f32 %v1361_v9, %v4816_v53  ;;  %v2014_v6 = vadd.f32 %v1554_v20, %v4817_v60  ;;  %v1363_v26 = vpop.f32.mrb[111].mxu0  ;;  %v1556_v58 = vpop.f32.mrb[111].mxu1 }
 0x1e3   : > { %v4585_v41 = vadd.f32 %v1363_v26, %v4390_v28  ;;  %v4588_v62 = vadd.f32 %v4393_v52, %v1556_v58 }
 0x1e4   : > { %v1998_v11 = vadd.f32 %v4540_v57, %v1966_v25  ;;  %v2046_v13 = vadd.f32 %v4540_v57, %v2014_v6 }
 0x1e5   : > { %v1560_v5 = vpop.f32.mrb[112].mxu1  ;;  %v2632_v14 = vpop.f32.mrb[112].mxu0 }
 0x1e6   : > { %2254 = vst [vmem:[%s3921_s12 + $0x3d8] sm:$0xff] %v1998_v11  ;;  %2496 = vst [vmem:[%s3921_s12 + $0x1f0] sm:$0xff] %v2046_v13  ;;  %v2015_v38 = vadd.f32 %v1560_v5, %v4818_v63  ;;  %v2128_v61 = vadd.f32 %v2632_v14, %v4415_v59  ;;  %v1562_v28 = vpop.f32.mrb[113].mxu1  ;;  %v1737_v15 = vpop.f32.mrb[113].mxu0  ;;  %v4819_v59 = vld [vmem:[#allocation16_spill] sm:$0xff] }
 0x1e7   : > { %v4597_v52 = vadd.f32 %v4400_v1, %v1562_v28  ;;  %v2127_v21 = vadd.f32 %v4403_v0, %v1737_v15 }
 0x1e8   : > { %v2047_v4 = vadd.f32 %v4540_v57, %v2015_v38  ;;  %v2160_v8 = vadd.f32 %v4540_v57, %v2128_v61 }
 0x1e9   : > { %v2159_v10 = vadd.f32 %v4540_v57, %v2127_v21  ;;  %v1566_v51 = vpop.f32.mrb[114].mxu1  ;;  %v2635_v32 = vpop.f32.mrb[114].mxu0 }
 0x1ea   : > { %2497 = vst [vmem:[%s3921_s12 + $0x220] sm:$0xff] %v2047_v4  ;;  %2514 = vst [vmem:[%s3921_s12 + $0x38] sm:$0xff] %v2160_v8  ;;  %v2016_v47 = vadd.f32 %v1566_v51, %v4819_v59  ;;  %v2130_v48 = vadd.f32 %v2635_v32, %v4439_v45  ;;  %v1568_v1 = vpop.f32.mrb[115].mxu1  ;;  %v1747_v31 = vpop.f32.mrb[115].mxu0  ;;  %v4820_v45 = vld [vmem:[#allocation17_spill] sm:$0xff] }
 0x1eb   : > { %2513 = vst [vmem:[%s3921_s12 + $0x28] sm:$0xff] %v2159_v10  ;;  %v4609_v0 = vadd.f32 %v4412_v34, %v1568_v1  ;;  %v2129_v18 = vadd.f32 %v4427_v33, %v1747_v31 }
 0x1ec   : > { %v2048_v35 = vadd.f32 %v4540_v57, %v2016_v47  ;;  %v2162_v50 = vadd.f32 %v4540_v57, %v2130_v48 }
 0x1ed   : > { %v2161_v55 = vadd.f32 %v4540_v57, %v2129_v18  ;;  %v1572_v9 = vpop.f32.mrb[116].mxu1  ;;  %v2638_v20 = vpop.f32.mrb[116].mxu0 }
 0x1ee   : > { %2498 = vst [vmem:[%s3921_s12 + $0x230] sm:$0xff] %v2048_v35  ;;  %2516 = vst [vmem:[%s3921_s12 + $0x78] sm:$0xff] %v2162_v50  ;;  %v2017_v53 = vadd.f32 %v1572_v9, %v4820_v45  ;;  %v2132_v25 = vadd.f32 %v2638_v20, %v4463_v42  ;;  %v1574_v34 = vpop.f32.mrb[117].mxu1  ;;  %v1757_v60 = vpop.f32.mrb[117].mxu0  ;;  %v4821_v42 = vld [vmem:[#allocation18_spill] sm:$0xff] }
 0x1ef   : > { %2515 = vst [vmem:[%s3921_s12 + $0x68] sm:$0xff] %v2161_v55  ;;  %v4621_v33 = vadd.f32 %v4424_v36, %v1574_v34  ;;  %v2131_v6 = vadd.f32 %v4451_v19, %v1757_v60 }
 0x1f0   : > { %v2049_v26 = vadd.f32 %v4540_v57, %v2017_v53  ;;  %v2164_v58 = vadd.f32 %v4540_v57, %v2132_v25 }
 0x1f1   : > { %v2163_v11 = vadd.f32 %v4540_v57, %v2131_v6  ;;  %v1578_v13 = vpop.f32.mrb[118].mxu1  ;;  %v2641_v5 = vpop.f32.mrb[118].mxu0 }
 0x1f2   : > { %2499 = vst [vmem:[%s3921_s12 + $0x260] sm:$0xff] %v2049_v26  ;;  %2518 = vst [vmem:[%s3921_s12 + $0xb8] sm:$0xff] %v2164_v58  ;;  %v2018_v14 = vadd.f32 %v1578_v13, %v4821_v42  ;;  %v2134_v63 = vadd.f32 %v2641_v5, %v4487_v29  ;;  %v1580_v36 = vpop.f32.mrb[119].mxu1  ;;  %v1767_v38 = vpop.f32.mrb[119].mxu0  ;;  %v4822_v29 = vld [vmem:[#allocation19_spill] sm:$0xff] }
 0x1f3   : > { %2517 = vst [vmem:[%s3921_s12 + $0xa8] sm:$0xff] %v2163_v11  ;;  %v4633_v19 = vadd.f32 %v4436_v7, %v1580_v36  ;;  %v2133_v61 = vadd.f32 %v4475_v43, %v1767_v38 }
 0x1f4   : > { %v2050_v28 = vadd.f32 %v4540_v57, %v2018_v14  ;;  %v2166_v15 = vadd.f32 %v4540_v57, %v2134_v63 }
 0x1f5   : > { %v2165_v21 = vadd.f32 %v4540_v57, %v2133_v61  ;;  %v1584_v4 = vpop.f32.mrb[120].mxu1  ;;  %v2644_v8 = vpop.f32.mrb[120].mxu0 }
 0x1f6   : > { %2500 = vst [vmem:[%s3921_s12 + $0x270] sm:$0xff] %v2050_v28  ;;  %2520 = vst [vmem:[%s3921_s12 + $0xf8] sm:$0xff] %v2166_v15  ;;  %v2019_v10 = vadd.f32 %v1584_v4, %v4822_v29  ;;  %v2136_v51 = vadd.f32 %v2644_v8, %v4511_v39  ;;  %v1586_v7 = vpop.f32.mrb[121].mxu1  ;;  %v1777_v32 = vpop.f32.mrb[121].mxu0  ;;  %v4823_v39 = vld [vmem:[#allocation20_spill] sm:$0xff] }
 0x1f7   : > { %2519 = vst [vmem:[%s3921_s12 + $0xe8] sm:$0xff] %v2165_v21  ;;  %v4645_v43 = vadd.f32 %v4448_v2, %v1586_v7  ;;  %v2135_v59 = vadd.f32 %v4499_v3, %v1777_v32 }
 0x1f8   : > { %v2051_v47 = vadd.f32 %v4540_v57, %v2019_v10  ;;  %v2168_v48 = vadd.f32 %v4540_v57, %v2136_v51 }
 0x1f9   : > { %v2167_v1 = vadd.f32 %v4540_v57, %v2135_v59  ;;  %v1590_v31 = vpop.f32.mrb[122].mxu1  ;;  %v2647_v18 = vpop.f32.mrb[122].mxu0 }
 0x1fa   : > { %2501 = vst [vmem:[%s3921_s12 + $0x2a0] sm:$0xff] %v2051_v47  ;;  %2522 = vst [vmem:[%s3921_s12 + $0x138] sm:$0xff] %v2168_v48  ;;  %v2020_v35 = vadd.f32 %v1590_v31, %v4823_v39  ;;  %v2138_v50 = vadd.f32 %v2647_v18, %v4535_v44  ;;  %v1592_v2 = vpop.f32.mrb[123].mxu1  ;;  %v1787_v55 = vpop.f32.mrb[123].mxu0  ;;  %v4824_v44 = vld [vmem:[#allocation21_spill] sm:$0xff] }
 0x1fb   : > { %2521 = vst [vmem:[%s3921_s12 + $0x128] sm:$0xff] %v2167_v1  ;;  %v4657_v3 = vadd.f32 %v4460_v24, %v1592_v2  ;;  %v2137_v9 = vadd.f32 %v4523_v46, %v1787_v55 }
 0x1fc   : > { %v2052_v20 = vadd.f32 %v4540_v57, %v2020_v35  ;;  %v2170_v45 = vadd.f32 %v4540_v57, %v2138_v50 }
 0x1fd   : > { %v2169_v53 = vadd.f32 %v4540_v57, %v2137_v9  ;;  %v1596_v25 = vpop.f32.mrb[124].mxu1  ;;  %v2650_v34 = vpop.f32.mrb[124].mxu0 }
 0x1fe   : > { %2502 = vst [vmem:[%s3921_s12 + $0x2b0] sm:$0xff] %v2052_v20  ;;  %2524 = vst [vmem:[%s3921_s12 + $0x178] sm:$0xff] %v2170_v45  ;;  %v2021_v60 = vadd.f32 %v1596_v25, %v4824_v44  ;;  %v2140_v6 = vadd.f32 %v2650_v34, %v4564_v12  ;;  %v1598_v24 = vpop.f32.mrb[125].mxu1  ;;  %v1797_v26 = vpop.f32.mrb[125].mxu0  ;;  %v4825_v12 = vld [vmem:[#allocation22_spill] sm:$0xff] }
 0x1ff   : > { %2523 = vst [vmem:[%s3921_s12 + $0x168] sm:$0xff] %v2169_v53  ;;  %v4669_v46 = vadd.f32 %v4472_v17, %v1598_v24  ;;  %v2139_v58 = vadd.f32 %v4552_v27, %v1797_v26 }
 0x200   : > { %v2053_v11 = vadd.f32 %v4540_v57, %v2021_v60  ;;  %v2172_v13 = vadd.f32 %v4540_v57, %v2140_v6 }
 0x201   : > { %v2171_v5 = vadd.f32 %v4540_v57, %v2139_v58  ;;  %v1602_v42 = vpop.f32.mrb[126].mxu1  ;;  %v2653_v14 = vpop.f32.mrb[126].mxu0 }
 0x202   : > { %2503 = vst [vmem:[%s3921_s12 + $0x2e0] sm:$0xff] %v2053_v11  ;;  %2526 = vst [vmem:[%s3921_s12 + $0x1b8] sm:$0xff] %v2172_v13  ;;  %v2022_v63 = vadd.f32 %v1602_v42, %v4825_v12  ;;  %v2142_v36 = vadd.f32 %v2653_v14, %v4588_v62  ;;  %v1604_v17 = vpop.f32.mrb[127].mxu1  ;;  %v1807_v38 = vpop.f32.mrb[127].mxu0  ;;  %v4826_v62 = vld [vmem:[#allocation23_spill] sm:$0xff] }
 0x203   : > { %2525 = vst [vmem:[%s3921_s12 + $0x1a8] sm:$0xff] %v2171_v5  ;;  %v2118_v27 = vadd.f32 %v4484_v54, %v1604_v17  ;;  %v2141_v61 = vadd.f32 %v4576_v37, %v1807_v38  ;;  %v4830_v17 = vld [vmem:[#allocation27_spill] sm:$0xff] }
 0x204   : > { %v2054_v28 = vadd.f32 %v4540_v57, %v2022_v63  ;;  %v2174_v15 = vadd.f32 %v4540_v57, %v2142_v36 }
 0x205   : > { %v2173_v21 = vadd.f32 %v4540_v57, %v2141_v61  ;;  %v1608_v4 = vpop.f32.mrb[128].mxu1  ;;  %v2656_v8 = vpop.f32.mrb[128].mxu0 }
 0x206   : > { %2504 = vst [vmem:[%s3921_s12 + $0x2f0] sm:$0xff] %v2054_v28  ;;  %2528 = vst [vmem:[%s3921_s12 + $0x1f8] sm:$0xff] %v2174_v15  ;;  %v2023_v29 = vadd.f32 %v1608_v4, %v4826_v62  ;;  %v2144_v10 = vadd.f32 %v2656_v8, %v4609_v0  ;;  %v1610_v51 = vpop.f32.mrb[129].mxu1  ;;  %v1817_v54 = vpop.f32.mrb[129].mxu0  ;;  %v4827_v0 = vld [vmem:[#allocation24_spill] sm:$0xff] }
 0x207   : > { %2527 = vst [vmem:[%s3921_s12 + $0x1e8] sm:$0xff] %v2173_v21  ;;  %v2119_v37 = vadd.f32 %v4496_v23, %v1610_v51  ;;  %v2143_v7 = vadd.f32 %v4597_v52, %v1817_v54 }
 0x208   : > { %v2055_v32 = vadd.f32 %v4540_v57, %v2023_v29  ;;  %v2176_v59 = vadd.f32 %v4540_v57, %v2144_v10  ;;  %v4831_v29 = vld [vmem:[#allocation28_spill] sm:$0xff] }
 0x209   : > { %v2175_v47 = vadd.f32 %v4540_v57, %v2143_v7  ;;  %v1614_v48 = vpop.f32.mrb[130].mxu1  ;;  %v2659_v1 = vpop.f32.mrb[130].mxu0 }
 0x20a   : > { %2505 = vst [vmem:[%s3921_s12 + $0x320] sm:$0xff] %v2055_v32  ;;  %2530 = vst [vmem:[%s3921_s12 + $0x238] sm:$0xff] %v2176_v59  ;;  %v2024_v31 = vadd.f32 %v1614_v48, %v4827_v0  ;;  %v2146_v18 = vadd.f32 %v2659_v1, %v4633_v19  ;;  %v1616_v39 = vpop.f32.mrb[131].mxu1  ;;  %v1827_v23 = vpop.f32.mrb[131].mxu0  ;;  %v4828_v19 = vld [vmem:[#allocation25_spill] sm:$0xff] }
 0x20b   : > { %2529 = vst [vmem:[%s3921_s12 + $0x228] sm:$0xff] %v2175_v47  ;;  %v2120_v52 = vadd.f32 %v4508_v56, %v1616_v39  ;;  %v2145_v35 = vadd.f32 %v4621_v33, %v1827_v23  ;;  %v4832_v0 = vld [vmem:[#allocation29_spill] sm:$0xff] }
 0x20c   : > { %v2056_v50 = vadd.f32 %v4540_v57, %v2024_v31  ;;  %v2178_v2 = vadd.f32 %v4540_v57, %v2146_v18 }
 0x20d   : > { %v2177_v55 = vadd.f32 %v4540_v57, %v2145_v35  ;;  %v1620_v9 = vpop.f32.mrb[132].mxu1  ;;  %v2662_v20 = vpop.f32.mrb[132].mxu0 }
 0x20e   : > { %2506 = vst [vmem:[%s3921_s12 + $0x330] sm:$0xff] %v2056_v50  ;;  %2532 = vst [vmem:[%s3921_s12 + $0x278] sm:$0xff] %v2178_v2  ;;  %v2025_v45 = vadd.f32 %v1620_v9, %v4828_v19  ;;  %v2148_v53 = vadd.f32 %v2662_v20, %v4657_v3  ;;  %v1622_v25 = vpop.f32.mrb[133].mxu1  ;;  %v1837_v56 = vpop.f32.mrb[133].mxu0  ;;  %v4829_v3 = vld [vmem:[#allocation26_spill] sm:$0xff] }
 0x20f   : > { %2531 = vst [vmem:[%s3921_s12 + $0x268] sm:$0xff] %v2177_v55  ;;  %v2121_v33 = vadd.f32 %v4520_v16, %v1622_v25  ;;  %v2147_v34 = vadd.f32 %v4645_v43, %v1837_v56  ;;  %v4833_v20 = vld [vmem:[#allocation30_spill] sm:$0xff] }
 0x210   : > { %v2057_v44 = vadd.f32 %v4540_v57, %v2025_v45  ;;  %v2180_v60 = vadd.f32 %v4540_v57, %v2148_v53 }
 0x211   : > { %v2179_v6 = vadd.f32 %v4540_v57, %v2147_v34  ;;  %v1626_v24 = vpop.f32.mrb[134].mxu1  ;;  %v2665_v26 = vpop.f32.mrb[134].mxu0 }
 0x212   : > { %2507 = vst [vmem:[%s3921_s12 + $0x360] sm:$0xff] %v2057_v44  ;;  %2534 = vst [vmem:[%s3921_s12 + $0x2b8] sm:$0xff] %v2180_v60  ;;  %v2026_v58 = vadd.f32 %v1626_v24, %v4829_v3  ;;  %v2150_v11 = vadd.f32 %v2665_v26, %v2118_v27  ;;  %v1628_v13 = vpop.f32.mrb[135].mxu1  ;;  %v1847_v16 = vpop.f32.mrb[135].mxu0 }
 0x213   : > { %2533 = vst [vmem:[%s3921_s12 + $0x2a8] sm:$0xff] %v2179_v6  ;;  %v2122_v43 = vadd.f32 %v4532_v22, %v1628_v13  ;;  %v2149_v5 = vadd.f32 %v4669_v46, %v1847_v16 }
 0x214   : > { %v2058_v42 = vadd.f32 %v4540_v57, %v2026_v58  ;;  %v2182_v14 = vadd.f32 %v4540_v57, %v2150_v11 }
 0x215   : > { %v2181_v12 = vadd.f32 %v4540_v57, %v2149_v5  ;;  %v1632_v63 = vpop.f32.mrb[136].mxu1  ;;  %v2668_v36 = vpop.f32.mrb[136].mxu0 }
 0x216   : > { %2508 = vst [vmem:[%s3921_s12 + $0x370] sm:$0xff] %v2058_v42  ;;  %2536 = vst [vmem:[%s3921_s12 + $0x2f8] sm:$0xff] %v2182_v14  ;;  %v2027_v38 = vadd.f32 %v1632_v63, %v4830_v17  ;;  %v2152_v27 = vadd.f32 %v2668_v36, %v2120_v52  ;;  %v1634_v61 = vpop.f32.mrb[137].mxu1  ;;  %v1857_v22 = vpop.f32.mrb[137].mxu0 }
 0x217   : > { %2535 = vst [vmem:[%s3921_s12 + $0x2e8] sm:$0xff] %v2181_v12  ;;  %v2123_v46 = vadd.f32 %v4549_v30, %v1634_v61  ;;  %v2151_v28 = vadd.f32 %v2119_v37, %v1857_v22 }
 0x218   : > { %v2059_v15 = vadd.f32 %v4540_v57, %v2027_v38  ;;  %v2184_v21 = vadd.f32 %v4540_v57, %v2152_v27 }
 0x219   : > { %v2183_v4 = vadd.f32 %v4540_v57, %v2151_v28  ;;  %v1638_v8 = vpop.f32.mrb[138].mxu1  ;;  %v2671_v62 = vpop.f32.mrb[138].mxu0 }
 0x21a   : > { %2509 = vst [vmem:[%s3921_s12 + $0x3a0] sm:$0xff] %v2059_v15  ;;  %2538 = vst [vmem:[%s3921_s12 + $0x338] sm:$0xff] %v2184_v21  ;;  %v2028_v10 = vadd.f32 %v1638_v8, %v4831_v29  ;;  %v2154_v51 = vadd.f32 %v2671_v62, %v2122_v43  ;;  %v1640_v54 = vpop.f32.mrb[139].mxu1  ;;  %v1867_v7 = vpop.f32.mrb[139].mxu0 }
 0x21b   : > { %2537 = vst [vmem:[%s3921_s12 + $0x328] sm:$0xff] %v2183_v4  ;;  %v2124_v30 = vadd.f32 %v4561_v49, %v1640_v54  ;;  %v2153_v37 = vadd.f32 %v2121_v33, %v1867_v7 }
 0x21c   : > { %v2060_v32 = vadd.f32 %v4540_v57, %v2028_v10  ;;  %v2186_v59 = vadd.f32 %v4540_v57, %v2154_v51 }
 0x21d   : > { %v2185_v47 = vadd.f32 %v4540_v57, %v2153_v37  ;;  %v1644_v48 = vpop.f32.mrb[140].mxu1  ;;  %v2674_v1 = vpop.f32.mrb[140].mxu0 }
 0x21e   : > { %2510 = vst [vmem:[%s3921_s12 + $0x3b0] sm:$0xff] %v2060_v32  ;;  %2540 = vst [vmem:[%s3921_s12 + $0x378] sm:$0xff] %v2186_v59  ;;  %v2029_v31 = vadd.f32 %v1644_v48, %v4832_v0  ;;  %v2156_v18 = vadd.f32 %v2674_v1, %v2124_v30  ;;  %v1646_v39 = vpop.f32.mrb[141].mxu1  ;;  %v1877_v23 = vpop.f32.mrb[141].mxu0 }
 0x21f   : > { %2539 = vst [vmem:[%s3921_s12 + $0x368] sm:$0xff] %v2185_v47  ;;  %v2125_v49 = vadd.f32 %v4573_v40, %v1646_v39  ;;  %v2155_v52 = vadd.f32 %v2123_v46, %v1877_v23 }
 0x220   : > { %v2061_v35 = vadd.f32 %v4540_v57, %v2029_v31  ;;  %v2188_v50 = vadd.f32 %v4540_v57, %v2156_v18 }
 0x221   : > { %v2187_v2 = vadd.f32 %v4540_v57, %v2155_v52  ;;  %v1650_v55 = vpop.f32.mrb[142].mxu1  ;;  %v2677_v9 = vpop.f32.mrb[142].mxu0 }
 0x222   : > { %2511 = vst [vmem:[%s3921_s12 + $0x3e0] sm:$0xff] %v2061_v35  ;;  %2542 = vst [vmem:[%s3921_s12 + $0x3b8] sm:$0xff] %v2188_v50  ;;  %v2030_v19 = vadd.f32 %v1650_v55, %v4833_v20  ;;  %v1652_v45 = vpop.f32.mrb[143].mxu1  ;;  %v1887_v53 = vpop.f32.mrb[143].mxu0 }
 0x223   : > { %2541 = vst [vmem:[%s3921_s12 + $0x3a8] sm:$0xff] %v2187_v2  ;;  %v2126_v40 = vadd.f32 %v4585_v41, %v1652_v45  ;;  %v2157_v25 = vadd.f32 %v2125_v49, %v1887_v53 }
 0x224   : > { %v2062_v56 = vadd.f32 %v4540_v57, %v2030_v19 }
 0x225   : > { %v2158_v33 = vadd.f32 %v2677_v9, %v2126_v40  ;;  %v2189_v34 = vadd.f32 %v4540_v57, %v2157_v25 }
 0x226   : > { %2512 = vst [vmem:[%s3921_s12 + $0x3f0] sm:$0xff] %v2062_v56 }
 0x227   : > { %v2190_v44 = vadd.f32 %v4540_v57, %v2158_v33  ;;  %2543 = vst [vmem:[%s3921_s12 + $0x3e8] sm:$0xff] %v2189_v34 }
 0x229   : > { %2544 = vst [vmem:[%s3921_s12 + $0x3f8] sm:$0xff] %v2190_v44 }
 0x22a PF: > { %s17_s26 = sadd.s32 1, %s2910_s26   ;;  %s4834_s24 = smov %s2906_s25 }
 0x22b   : > { %p14_p5 = scmp.ge.s32.totalorder %s17_s26, 4   ;;  %s4835_s25 = smov %s4837_s27 }
 0x22d   :  { %16 = sbr.rel (!%p14_p5) target bundleno = 2 (0x2), region = 82 }

</bundles_post_ra>
